<compile_context>
chip_gen: v7x
topology: tpu7x:2x2x1
jax: 0.10.0
libtpu: 0.0.40
codegen_flags: <defaults>
</compile_context>

<pallas_src>
import numpy as np
import jax
import jax.numpy as jnp
from jax import lax
from jax.experimental import pallas as pl
from jax.experimental.pallas import tpu as pltpu

EPS = 1e-5
# Conservative scoped-VMEM limit: fits under v7x's 64 MiB physical VMEM with
# headroom, and is a plain raise over the v5e/v6e defaults.
_VMEM_LIMIT = 48 * 1024 * 1024


def _pick_tile(rows, cap=512):
    """Largest row-tile <= cap that divides `rows` and yields >= 2 grid steps."""
    for t in (512, 256, 128, 64, 32, 16, 8):
        if t <= cap and rows % t == 0 and rows // t >= 2:
            return t
    return rows  # whole-array block (always legal: block == full dims)


# ----------------------------- Pallas kernels ------------------------------ #

def _conv_relu_stats_kernel(p_ref, w_ref, b_ref, y_ref, sum_ref, sq_ref):
    """Pass 1: conv (as matmul) + bias + ReLU on a row tile; accumulate BN stats.

    p: (TM, D) im2col rows (even- and odd-position rows stacked by the wrapper)
    w: (D, C)   b: (1, C)
    y: (TM, C)  conv+ReLU output tile (pre-BN)
    sum/sq: (1, C) resident accumulators (same block for every grid step).
    """
    @pl.when(pl.program_id(0) == 0)
    def _():
        sum_ref[...] = jnp.zeros_like(sum_ref)
        sq_ref[...] = jnp.zeros_like(sq_ref)

    y = jnp.dot(p_ref[...], w_ref[...], preferred_element_type=jnp.float32)
    y = jnp.maximum(y + b_ref[...], 0.0)
    y_ref[...] = y
    sum_ref[...] += jnp.sum(y, axis=0, keepdims=True)
    sq_ref[...] += jnp.sum(y * y, axis=0, keepdims=True)


def _make_bn_maxpool_kernel(n_rows):
    inv_n = 1.0 / float(n_rows)

    def kernel(ye_ref, yo_ref, sum_ref, sq_ref, out_ref):
        """Pass 2: BatchNorm (training-mode, identity affine) + MaxPool1d(2,2)."""
        mean = sum_ref[...] * inv_n
        var = sq_ref[...] * inv_n - mean * mean      # biased variance (PyTorch BN)
        inv = lax.rsqrt(var + EPS)
        ne = (ye_ref[...] - mean) * inv
        no = (yo_ref[...] - mean) * inv
        out_ref[...] = jnp.maximum(ne, no)

    return kernel


def _conv_bn_avgpool_fc_kernel(p_ref, w_ref, b_ref, pool_ref, wfc_ref, bfc_ref,
                               out_ref):
    """Block 3: conv (flat 2-D matmul) + ReLU + BN + AdaptiveAvgPool1d(1) + Linear.

    p:    (R, D) with R = B * L3 (rows in (b, t) order)
    w:    (D, C)      b: (1, C)
    pool: (B, R) selector matrix, pool[b, r] = 1/L3 iff row r belongs to batch b
    wfc:  (C, E)      bfc: (1, E)       out: (B, E)
    """
    y = jnp.dot(p_ref[...], w_ref[...], preferred_element_type=jnp.float32)
    y = jnp.maximum(y + b_ref[...], 0.0)

    n = float(y.shape[0])
    s = jnp.sum(y, axis=0, keepdims=True)
    q = jnp.sum(y * y, axis=0, keepdims=True)
    mean = s / n
    var = q / n - mean * mean
    y = (y - mean) * lax.rsqrt(var + EPS)

    pooled = jnp.dot(pool_ref[...], y, preferred_element_type=jnp.float32)  # (B, C)
    out_ref[...] = (jnp.dot(pooled, wfc_ref[...],
                            preferred_element_type=jnp.float32) + bfc_ref[...])


# ----------------------------- pallas_call glue ----------------------------- #

def conv_relu_stats(p2d, w_flat, b):
    """p2d: (2N, D) stacked even/odd patch rows -> (y, sum, sumsq)."""
    R, D = p2d.shape
    C = w_flat.shape[1]
    TM = _pick_tile(R)
    return pl.pallas_call(
        _conv_relu_stats_kernel,
        out_shape=(jax.ShapeDtypeStruct((R, C), jnp.float32),
                   jax.ShapeDtypeStruct((1, C), jnp.float32),
                   jax.ShapeDtypeStruct((1, C), jnp.float32)),
        grid=(R // TM,),
        in_specs=[pl.BlockSpec((TM, D), lambda i: (i, 0)),
                  pl.BlockSpec((D, C), lambda i: (0, 0)),
                  pl.BlockSpec((1, C), lambda i: (0, 0))],
        out_specs=[pl.BlockSpec((TM, C), lambda i: (i, 0)),
                   pl.BlockSpec((1, C), lambda i: (0, 0)),
                   pl.BlockSpec((1, C), lambda i: (0, 0))],
        compiler_params=pltpu.CompilerParams(
            dimension_semantics=("arbitrary",),      # stats accumulate across tiles
            vmem_limit_bytes=_VMEM_LIMIT),
    )(p2d, w_flat, b.reshape(1, C))


def bn_maxpool(ye, yo, s, q, n_rows):
    """Normalize with global stats (over n_rows positions) and max(even, odd)."""
    N, C = ye.shape
    TM = _pick_tile(N)
    return pl.pallas_call(
        _make_bn_maxpool_kernel(n_rows),
        out_shape=jax.ShapeDtypeStruct((N, C), jnp.float32),
        grid=(N // TM,),
        in_specs=[pl.BlockSpec((TM, C), lambda i: (i, 0)),
                  pl.BlockSpec((TM, C), lambda i: (i, 0)),
                  pl.BlockSpec((1, C), lambda i: (0, 0)),
                  pl.BlockSpec((1, C), lambda i: (0, 0))],
        out_specs=pl.BlockSpec((TM, C), lambda i: (i, 0)),
        compiler_params=pltpu.CompilerParams(
            dimension_semantics=("parallel",),       # independent tiles (2 TCs on v7x)
            vmem_limit_bytes=_VMEM_LIMIT),
    )(ye, yo, s, q)


def conv_bn_avgpool_fc(p2d, w_flat, b, pool_mat, wfc, bfc):
    R, D = p2d.shape
    C = w_flat.shape[1]
    B = pool_mat.shape[0]
    E = wfc.shape[1]
    return pl.pallas_call(
        _conv_bn_avgpool_fc_kernel,
        out_shape=jax.ShapeDtypeStruct((B, E), jnp.float32),
        grid=(1,),
        in_specs=[pl.BlockSpec((R, D), lambda i: (0, 0)),
                  pl.BlockSpec((D, C), lambda i: (0, 0)),
                  pl.BlockSpec((1, C), lambda i: (0, 0)),
                  pl.BlockSpec((B, R), lambda i: (0, 0)),
                  pl.BlockSpec((C, E), lambda i: (0, 0)),
                  pl.BlockSpec((1, E), lambda i: (0, 0))],
        out_specs=pl.BlockSpec((B, E), lambda i: (0, 0)),
        compiler_params=pltpu.CompilerParams(
            dimension_semantics=("arbitrary",),
            vmem_limit_bytes=_VMEM_LIMIT),
    )(p2d, w_flat, b.reshape(1, C), pool_mat, wfc, bfc.reshape(1, E))


# ------------------------------ JAX-side glue ------------------------------- #

def _im2col(h, K, stride, pad):
    """h: (B, L, C) channels-last -> (B, L_out, K*C) patches via static strided
    slices (no gather). Flattening is k-major, ci-minor."""
    B, L, C = h.shape
    hp = jnp.pad(h, ((0, 0), (pad, pad), (0, 0)))
    L_out = (L + 2 * pad - K) // stride + 1
    cols = [lax.slice(hp, (0, k, 0),
                      (B, k + (L_out - 1) * stride + 1, C),
                      (1, stride, 1))
            for k in range(K)]                       # K slices of (B, L_out, C)
    return jnp.concatenate(cols, axis=-1)            # (B, L_out, K*C)


def _flatten_conv_w(w):
    """(C_out, C_in, K) -> (K*C_in, C_out) matching the im2col (k, ci) flattening."""
    C_out, C_in, K = w.shape
    return jnp.transpose(w, (2, 1, 0)).reshape(K * C_in, C_out)


def _conv_block(h, w, b, K, stride, pad):
    """Conv1d + ReLU + BN(train) + MaxPool(2,2) on channels-last h: (B, L, C_in)."""
    B = h.shape[0]
    C_out = w.shape[0]
    p = _im2col(h, K, stride, pad)                   # (B, L_out, K*C_in)
    pe, po = p[:, 0::2], p[:, 1::2]                  # even / odd conv positions
    Np = pe.shape[1]
    D = p.shape[-1]
    N = B * Np
    # One fused (2N, D) @ (D, C) matmul: even rows first, odd rows second.
    p_all = jnp.concatenate([pe.reshape(N, D), po.reshape(N, D)], axis=0)
    y, s, q = conv_relu_stats(p_all, _flatten_conv_w(w), b)
    pooled = bn_maxpool(y[:N], y[N:], s, q, 2 * N)   # (N, C_out)
    return pooled.reshape(B, Np, C_out)


def vibration_encoder_forward(x, params):
    """x: (B, 1, L) float32 (PyTorch NCW). Returns (B, embedding_dim)."""
    B = x.shape[0]
    h = jnp.transpose(x, (0, 2, 1))                  # (B, L, 1) channels-last

    # Block 1: Conv1d(1,16,64,s2,p31) + ReLU + BN + MaxPool(2,2)
    h = _conv_block(h, params['w1'], params['b1'], K=64, stride=2, pad=31)
    # Block 2: Conv1d(16,32,32,s2,p15) + ReLU + BN + MaxPool(2,2)
    h = _conv_block(h, params['w2'], params['b2'], K=32, stride=2, pad=15)

    # Block 3: Conv1d(32,64,16,s2,p7) + ReLU + BN + AdaptiveAvgPool1d(1) + Linear
    p = _im2col(h, K=16, stride=2, pad=7)            # (B, L3, 512)
    _, L3, D3 = p.shape
    R = B * L3
    pool_mat = (jnp.arange(B)[:, None] ==
                (jnp.arange(R)[None, :] // L3)).astype(jnp.float32) / float(L3)
    return conv_bn_avgpool_fc(p.reshape(R, D3), _flatten_conv_w(params['w3']),
                              params['b3'], pool_mat, params['wfc'], params['bfc'])


def init_params(key, embedding_dim):
    """Deterministic PyTorch-style uniform init (BN affine is identity at init)."""
    ks = jax.random.split(key, 8)

    def u(k, shape, fan_in):
        bound = 1.0 / float(np.sqrt(fan_in))
        return jax.random.uniform(k, shape, jnp.float32, -bound, bound)

    return {
        'w1': u(ks[0], (16, 1, 64), 1 * 64),   'b1': u(ks[1], (16,), 1 * 64),
        'w2': u(ks[2], (32, 16, 32), 16 * 32), 'b2': u(ks[3], (32,), 16 * 32),
        'w3': u(ks[4], (64, 32, 16), 32 * 16), 'b3': u(ks[5], (64,), 32 * 16),
        'wfc': u(ks[6], (64, embedding_dim), 64),      # stored (in, out)
        'bfc': u(ks[7], (embedding_dim,), 64),
    }


# ------------------------------- reference ---------------------------------- #

def reference_forward(x, params):
    """Pure-JAX reference matching the PyTorch forward (training-mode BatchNorm)."""
    def bn(h):
        mean = jnp.mean(h, axis=(0, 2), keepdims=True)
        var = jnp.mean((h - mean) ** 2, axis=(0, 2), keepdims=True)
        return (h - mean) / jnp.sqrt(var + EPS)

    def conv(h, w, b, stride, pad):
        out = lax.conv_general_dilated(h, w, (stride,), [(pad, pad)],
                                       dimension_numbers=('NCH', 'OIH', 'NCH'))
        return out + b[None, :, None]

    def mp(h):
        B, C, L = h.shape
        return jnp.max(h.reshape(B, C, L // 2, 2), axis=-1)

    h = mp(bn(jax.nn.relu(conv(x, params['w1'], params['b1'], 2, 31))))
    h = mp(bn(jax.nn.relu(conv(h, params['w2'], params['b2'], 2, 15))))
    h = bn(jax.nn.relu(conv(h, params['w3'], params['b3'], 2, 7)))
    h = jnp.mean(h, axis=2)                          # AdaptiveAvgPool1d(1) + flatten
    return jnp.matmul(h, params['wfc']) + params['bfc']


if __name__ == "__main__":
    key = jax.random.PRNGKey(0)
    kx, kp = jax.random.split(key)

    B, L, E = 2, 256, 128                            # small shapes; L divisible by 32
    x = jax.random.normal(kx, (B, 1, L), jnp.float32)
    params = init_params(kp, embedding_dim=E)

    fwd = jax.jit(vibration_encoder_forward)
    out = jax.block_until_ready(fwd(x, params))
    assert out.shape == (B, E)

    ref = reference_forward(x, params)
    # Both sides now use default (fast) MXU precision -> slightly looser tolerance.
    np.testing.assert_allclose(np.asarray(out), np.asarray(ref), rtol=2e-2, atol=2e-2)

    print("KERNEL_OK")
</pallas_src>

<mosaic_0001>
module attributes {stable_mosaic.version = 11 : i64} {
  func.func @_conv_relu_stats_kernel(%arg0: i32, %arg1: memref<128x64xf32, #tpu.memory_space<vmem>>, %arg2: memref<64x16xf32, #tpu.memory_space<vmem>>, %arg3: memref<1x16xf32, #tpu.memory_space<vmem>>, %arg4: memref<128x16xf32, #tpu.memory_space<vmem>>, %arg5: memref<1x16xf32, #tpu.memory_space<vmem>>, %arg6: memref<1x16xf32, #tpu.memory_space<vmem>>) attributes {dimension_semantics = [#tpu.dimension_semantics<arbitrary>], iteration_bounds = array<i64: 2>, scalar_prefetch = 0 : i64, scratch_operands = 0 : i64, tpu.core_type = #tpu.core_type<tc>, window_params = [{transform_indices = @transform_0, window_bounds = array<i64: 128, 64>}, {pipeline_mode = #tpu.pipeline_mode<synchronous>, transform_indices = @transform_1, window_bounds = array<i64: 64, 16>}, {pipeline_mode = #tpu.pipeline_mode<synchronous>, transform_indices = @transform_2, window_bounds = array<i64: 1, 16>}, {transform_indices = @transform_3, window_bounds = array<i64: 128, 16>}, {pipeline_mode = #tpu.pipeline_mode<synchronous>, transform_indices = @transform_4, window_bounds = array<i64: 1, 16>}, {pipeline_mode = #tpu.pipeline_mode<synchronous>, transform_indices = @transform_5, window_bounds = array<i64: 1, 16>}]} {
    %c0_i32 = arith.constant 0 : i32
    %0 = arith.cmpi eq, %arg0, %c0_i32 : i32
    %1 = arith.extui %0 : i1 to i32
    %c0_i32_0 = arith.constant 0 : i32
    %2 = arith.cmpi ne, %1, %c0_i32_0 : i32
    scf.if %2 {
      %cst_19 = arith.constant 0.000000e+00 : f32
      %23 = vector.broadcast %cst_19 : f32 to vector<1x16xf32>
      %c0_20 = arith.constant 0 : index
      %c0_21 = arith.constant 0 : index
      %24 = vector.load %arg5[%c0_20, %c0_21] : memref<1x16xf32, #tpu.memory_space<vmem>>, vector<1x16xf32>
      tpu.vector_store %arg5[%c0_20, %c0_21], %23 {strides = array<i32>} : memref<1x16xf32, #tpu.memory_space<vmem>>, vector<1x16xf32>,
      %cst_22 = arith.constant 0.000000e+00 : f32
      %25 = vector.broadcast %cst_22 : f32 to vector<1x16xf32>
      %c0_23 = arith.constant 0 : index
      %c0_24 = arith.constant 0 : index
      %26 = vector.load %arg6[%c0_23, %c0_24] : memref<1x16xf32, #tpu.memory_space<vmem>>, vector<1x16xf32>
      tpu.vector_store %arg6[%c0_23, %c0_24], %25 {strides = array<i32>} : memref<1x16xf32, #tpu.memory_space<vmem>>, vector<1x16xf32>,
    } else {
    }
    %c0 = arith.constant 0 : index
    %c0_1 = arith.constant 0 : index
    %3 = vector.load %arg1[%c0, %c0_1] : memref<128x64xf32, #tpu.memory_space<vmem>>, vector<128x64xf32>
    %c0_2 = arith.constant 0 : index
    %c0_3 = arith.constant 0 : index
    %4 = vector.load %arg2[%c0_2, %c0_3] : memref<64x16xf32, #tpu.memory_space<vmem>>, vector<64x16xf32>
    %cst = arith.constant dense<0.000000e+00> : vector<128x16xf32>
    %5 = tpu.matmul %3, %4, %cst {dimension_numbers = #tpu.dot_dimension_numbers<[1], [0], [0], [1], [0, 0, 1, 1], [], []>} : vector<128x64xf32>, vector<64x16xf32>, vector<128x16xf32> -> vector<128x16xf32>
    %c0_4 = arith.constant 0 : index
    %c0_5 = arith.constant 0 : index
    %6 = vector.load %arg3[%c0_4, %c0_5] : memref<1x16xf32, #tpu.memory_space<vmem>>, vector<1x16xf32>
    %7 = vector.broadcast %6 : vector<1x16xf32> to vector<128x16xf32>
    %8 = arith.addf %5, %7 : vector<128x16xf32>
    %cst_6 = arith.constant 0.000000e+00 : f32
    %9 = vector.broadcast %cst_6 : f32 to vector<128x16xf32>
    %10 = arith.maximumf %8, %9 : vector<128x16xf32>
    %c0_7 = arith.constant 0 : index
    %c0_8 = arith.constant 0 : index
    %11 = vector.load %arg4[%c0_7, %c0_8] : memref<128x16xf32, #tpu.memory_space<vmem>>, vector<128x16xf32>
    tpu.vector_store %arg4[%c0_7, %c0_8], %10 {strides = array<i32>} : memref<128x16xf32, #tpu.memory_space<vmem>>, vector<128x16xf32>,
    %c0_9 = arith.constant 0 : index
    %c0_10 = arith.constant 0 : index
    %12 = vector.load %arg5[%c0_9, %c0_10] : memref<1x16xf32, #tpu.memory_space<vmem>>, vector<1x16xf32>
    %cst_11 = arith.constant dense<0.000000e+00> : vector<16xf32>
    %13 = vector.multi_reduction <add>, %10, %cst_11 [0] : vector<128x16xf32> to vector<16xf32>
    %14 = vector.shape_cast %13 : vector<16xf32> to vector<1x16xf32>
    %15 = arith.addf %12, %14 : vector<1x16xf32>
    %c0_12 = arith.constant 0 : index
    %c0_13 = arith.constant 0 : index
    %16 = vector.load %arg5[%c0_12, %c0_13] : memref<1x16xf32, #tpu.memory_space<vmem>>, vector<1x16xf32>
    tpu.vector_store %arg5[%c0_12, %c0_13], %15 {strides = array<i32>} : memref<1x16xf32, #tpu.memory_space<vmem>>, vector<1x16xf32>,
    %c0_14 = arith.constant 0 : index
    %c0_15 = arith.constant 0 : index
    %17 = vector.load %arg6[%c0_14, %c0_15] : memref<1x16xf32, #tpu.memory_space<vmem>>, vector<1x16xf32>
    %18 = arith.mulf %10, %10 : vector<128x16xf32>
    %cst_16 = arith.constant dense<0.000000e+00> : vector<16xf32>
    %19 = vector.multi_reduction <add>, %18, %cst_16 [0] : vector<128x16xf32> to vector<16xf32>
    %20 = vector.shape_cast %19 : vector<16xf32> to vector<1x16xf32>
    %21 = arith.addf %17, %20 : vector<1x16xf32>
    %c0_17 = arith.constant 0 : index
    %c0_18 = arith.constant 0 : index
    %22 = vector.load %arg6[%c0_17, %c0_18] : memref<1x16xf32, #tpu.memory_space<vmem>>, vector<1x16xf32>
    tpu.vector_store %arg6[%c0_17, %c0_18], %21 {strides = array<i32>} : memref<1x16xf32, #tpu.memory_space<vmem>>, vector<1x16xf32>,
    return
  }
  func.func @transform_0(%arg0: i32) -> (i32, i32) {
    %c0_i32 = arith.constant 0 : i32
    %c0_i32_0 = arith.constant 0 : i32
    return %arg0, %c0_i32 : i32, i32
  }
  func.func @transform_1(%arg0: i32) -> (i32, i32) {
    %c0_i32 = arith.constant 0 : i32
    %c0_i32_0 = arith.constant 0 : i32
    %c0_i32_1 = arith.constant 0 : i32
    return %c0_i32, %c0_i32_0 : i32, i32
  }
  func.func @transform_2(%arg0: i32) -> (i32, i32) {
    %c0_i32 = arith.constant 0 : i32
    %c0_i32_0 = arith.constant 0 : i32
    %c0_i32_1 = arith.constant 0 : i32
    return %c0_i32, %c0_i32_0 : i32, i32
  }
  func.func @transform_3(%arg0: i32) -> (i32, i32) {
    %c0_i32 = arith.constant 0 : i32
    %c0_i32_0 = arith.constant 0 : i32
    return %arg0, %c0_i32 : i32, i32
  }
  func.func @transform_4(%arg0: i32) -> (i32, i32) {
    %c0_i32 = arith.constant 0 : i32
    %c0_i32_0 = arith.constant 0 : i32
    %c0_i32_1 = arith.constant 0 : i32
    return %c0_i32, %c0_i32_0 : i32, i32
  }
  func.func @transform_5(%arg0: i32) -> (i32, i32) {
    %c0_i32 = arith.constant 0 : i32
    %c0_i32_0 = arith.constant 0 : i32
    %c0_i32_1 = arith.constant 0 : i32
    return %c0_i32, %c0_i32_0 : i32, i32
  }
}

module attributes {stable_mosaic.version = 11 : i64} {
  func.func @kernel(%arg0: i32, %arg1: memref<64x16xf32, #tpu.memory_space<vmem>>, %arg2: memref<64x16xf32, #tpu.memory_space<vmem>>, %arg3: memref<1x16xf32, #tpu.memory_space<vmem>>, %arg4: memref<1x16xf32, #tpu.memory_space<vmem>>, %arg5: memref<64x16xf32, #tpu.memory_space<vmem>>) attributes {dimension_semantics = [#tpu.dimension_semantics<parallel>], iteration_bounds = array<i64: 2>, scalar_prefetch = 0 : i64, scratch_operands = 0 : i64, tpu.core_type = #tpu.core_type<tc>, window_params = [{transform_indices = @transform_0, window_bounds = array<i64: 64, 16>}, {transform_indices = @transform_1, window_bounds = array<i64: 64, 16>}, {pipeline_mode = #tpu.pipeline_mode<synchronous>, transform_indices = @transform_2, window_bounds = array<i64: 1, 16>}, {pipeline_mode = #tpu.pipeline_mode<synchronous>, transform_indices = @transform_3, window_bounds = array<i64: 1, 16>}, {transform_indices = @transform_4, window_bounds = array<i64: 64, 16>}]} {
    %c0 = arith.constant 0 : index
    %c0_0 = arith.constant 0 : index
    %0 = vector.load %arg3[%c0, %c0_0] : memref<1x16xf32, #tpu.memory_space<vmem>>, vector<1x16xf32>
    %cst = arith.constant 3.906250e-03 : f32
    %1 = vector.broadcast %cst : f32 to vector<1x16xf32>
    %2 = arith.mulf %0, %1 : vector<1x16xf32>
    %c0_1 = arith.constant 0 : index
    %c0_2 = arith.constant 0 : index
    %3 = vector.load %arg4[%c0_1, %c0_2] : memref<1x16xf32, #tpu.memory_space<vmem>>, vector<1x16xf32>
    %cst_3 = arith.constant 3.906250e-03 : f32
    %4 = vector.broadcast %cst_3 : f32 to vector<1x16xf32>
    %5 = arith.mulf %3, %4 : vector<1x16xf32>
    %6 = arith.mulf %2, %2 : vector<1x16xf32>
    %7 = arith.subf %5, %6 : vector<1x16xf32>
    %cst_4 = arith.constant 9.99999974E-6 : f32
    %8 = vector.broadcast %cst_4 : f32 to vector<1x16xf32>
    %9 = arith.addf %7, %8 : vector<1x16xf32>
    %10 = math.rsqrt %9 : vector<1x16xf32>
    %c0_5 = arith.constant 0 : index
    %c0_6 = arith.constant 0 : index
    %11 = vector.load %arg1[%c0_5, %c0_6] : memref<64x16xf32, #tpu.memory_space<vmem>>, vector<64x16xf32>
    %12 = vector.broadcast %2 : vector<1x16xf32> to vector<64x16xf32>
    %13 = arith.subf %11, %12 : vector<64x16xf32>
    %14 = vector.broadcast %10 : vector<1x16xf32> to vector<64x16xf32>
    %15 = arith.mulf %13, %14 : vector<64x16xf32>
    %c0_7 = arith.constant 0 : index
    %c0_8 = arith.constant 0 : index
    %16 = vector.load %arg2[%c0_7, %c0_8] : memref<64x16xf32, #tpu.memory_space<vmem>>, vector<64x16xf32>
    %17 = vector.broadcast %2 : vector<1x16xf32> to vector<64x16xf32>
    %18 = arith.subf %16, %17 : vector<64x16xf32>
    %19 = vector.broadcast %10 : vector<1x16xf32> to vector<64x16xf32>
    %20 = arith.mulf %18, %19 : vector<64x16xf32>
    %21 = arith.maximumf %15, %20 : vector<64x16xf32>
    %c0_9 = arith.constant 0 : index
    %c0_10 = arith.constant 0 : index
    %22 = vector.load %arg5[%c0_9, %c0_10] : memref<64x16xf32, #tpu.memory_space<vmem>>, vector<64x16xf32>
    tpu.vector_store %arg5[%c0_9, %c0_10], %21 {strides = array<i32>} : memref<64x16xf32, #tpu.memory_space<vmem>>, vector<64x16xf32>,
    return
  }
  func.func @transform_0(%arg0: i32) -> (i32, i32) {
    %c0_i32 = arith.constant 0 : i32
    %c0_i32_0 = arith.constant 0 : i32
    return %arg0, %c0_i32 : i32, i32
  }
  func.func @transform_1(%arg0: i32) -> (i32, i32) {
    %c0_i32 = arith.constant 0 : i32
    %c0_i32_0 = arith.constant 0 : i32
    return %arg0, %c0_i32 : i32, i32
  }
  func.func @transform_2(%arg0: i32) -> (i32, i32) {
    %c0_i32 = arith.constant 0 : i32
    %c0_i32_0 = arith.constant 0 : i32
    %c0_i32_1 = arith.constant 0 : i32
    return %c0_i32, %c0_i32_0 : i32, i32
  }
  func.func @transform_3(%arg0: i32) -> (i32, i32) {
    %c0_i32 = arith.constant 0 : i32
    %c0_i32_0 = arith.constant 0 : i32
    %c0_i32_1 = arith.constant 0 : i32
    return %c0_i32, %c0_i32_0 : i32, i32
  }
  func.func @transform_4(%arg0: i32) -> (i32, i32) {
    %c0_i32 = arith.constant 0 : i32
    %c0_i32_0 = arith.constant 0 : i32
    return %arg0, %c0_i32 : i32, i32
  }
}

module attributes {stable_mosaic.version = 11 : i64} {
  func.func @_conv_relu_stats_kernel(%arg0: i32, %arg1: memref<32x512xf32, #tpu.memory_space<vmem>>, %arg2: memref<512x32xf32, #tpu.memory_space<vmem>>, %arg3: memref<1x32xf32, #tpu.memory_space<vmem>>, %arg4: memref<32x32xf32, #tpu.memory_space<vmem>>, %arg5: memref<1x32xf32, #tpu.memory_space<vmem>>, %arg6: memref<1x32xf32, #tpu.memory_space<vmem>>) attributes {dimension_semantics = [#tpu.dimension_semantics<arbitrary>], iteration_bounds = array<i64: 2>, scalar_prefetch = 0 : i64, scratch_operands = 0 : i64, tpu.core_type = #tpu.core_type<tc>, window_params = [{transform_indices = @transform_0, window_bounds = array<i64: 32, 512>}, {pipeline_mode = #tpu.pipeline_mode<synchronous>, transform_indices = @transform_1, window_bounds = array<i64: 512, 32>}, {pipeline_mode = #tpu.pipeline_mode<synchronous>, transform_indices = @transform_2, window_bounds = array<i64: 1, 32>}, {transform_indices = @transform_3, window_bounds = array<i64: 32, 32>}, {pipeline_mode = #tpu.pipeline_mode<synchronous>, transform_indices = @transform_4, window_bounds = array<i64: 1, 32>}, {pipeline_mode = #tpu.pipeline_mode<synchronous>, transform_indices = @transform_5, window_bounds = array<i64: 1, 32>}]} {
    %c0_i32 = arith.constant 0 : i32
    %0 = arith.cmpi eq, %arg0, %c0_i32 : i32
    %1 = arith.extui %0 : i1 to i32
    %c0_i32_0 = arith.constant 0 : i32
    %2 = arith.cmpi ne, %1, %c0_i32_0 : i32
    scf.if %2 {
      %cst_19 = arith.constant 0.000000e+00 : f32
      %23 = vector.broadcast %cst_19 : f32 to vector<1x32xf32>
      %c0_20 = arith.constant 0 : index
      %c0_21 = arith.constant 0 : index
      %24 = vector.load %arg5[%c0_20, %c0_21] : memref<1x32xf32, #tpu.memory_space<vmem>>, vector<1x32xf32>
      tpu.vector_store %arg5[%c0_20, %c0_21], %23 {strides = array<i32>} : memref<1x32xf32, #tpu.memory_space<vmem>>, vector<1x32xf32>,
      %cst_22 = arith.constant 0.000000e+00 : f32
      %25 = vector.broadcast %cst_22 : f32 to vector<1x32xf32>
      %c0_23 = arith.constant 0 : index
      %c0_24 = arith.constant 0 : index
      %26 = vector.load %arg6[%c0_23, %c0_24] : memref<1x32xf32, #tpu.memory_space<vmem>>, vector<1x32xf32>
      tpu.vector_store %arg6[%c0_23, %c0_24], %25 {strides = array<i32>} : memref<1x32xf32, #tpu.memory_space<vmem>>, vector<1x32xf32>,
    } else {
    }
    %c0 = arith.constant 0 : index
    %c0_1 = arith.constant 0 : index
    %3 = vector.load %arg1[%c0, %c0_1] : memref<32x512xf32, #tpu.memory_space<vmem>>, vector<32x512xf32>
    %c0_2 = arith.constant 0 : index
    %c0_3 = arith.constant 0 : index
    %4 = vector.load %arg2[%c0_2, %c0_3] : memref<512x32xf32, #tpu.memory_space<vmem>>, vector<512x32xf32>
    %cst = arith.constant dense<0.000000e+00> : vector<32x32xf32>
    %5 = tpu.matmul %3, %4, %cst {dimension_numbers = #tpu.dot_dimension_numbers<[1], [0], [0], [1], [0, 0, 1, 1], [], []>} : vector<32x512xf32>, vector<512x32xf32>, vector<32x32xf32> -> vector<32x32xf32>
    %c0_4 = arith.constant 0 : index
    %c0_5 = arith.constant 0 : index
    %6 = vector.load %arg3[%c0_4, %c0_5] : memref<1x32xf32, #tpu.memory_space<vmem>>, vector<1x32xf32>
    %7 = vector.broadcast %6 : vector<1x32xf32> to vector<32x32xf32>
    %8 = arith.addf %5, %7 : vector<32x32xf32>
    %cst_6 = arith.constant 0.000000e+00 : f32
    %9 = vector.broadcast %cst_6 : f32 to vector<32x32xf32>
    %10 = arith.maximumf %8, %9 : vector<32x32xf32>
    %c0_7 = arith.constant 0 : index
    %c0_8 = arith.constant 0 : index
    %11 = vector.load %arg4[%c0_7, %c0_8] : memref<32x32xf32, #tpu.memory_space<vmem>>, vector<32x32xf32>
    tpu.vector_store %arg4[%c0_7, %c0_8], %10 {strides = array<i32>} : memref<32x32xf32, #tpu.memory_space<vmem>>, vector<32x32xf32>,
    %c0_9 = arith.constant 0 : index
    %c0_10 = arith.constant 0 : index
    %12 = vector.load %arg5[%c0_9, %c0_10] : memref<1x32xf32, #tpu.memory_space<vmem>>, vector<1x32xf32>
    %cst_11 = arith.constant dense<0.000000e+00> : vector<32xf32>
    %13 = vector.multi_reduction <add>, %10, %cst_11 [0] : vector<32x32xf32> to vector<32xf32>
    %14 = vector.shape_cast %13 : vector<32xf32> to vector<1x32xf32>
    %15 = arith.addf %12, %14 : vector<1x32xf32>
    %c0_12 = arith.constant 0 : index
    %c0_13 = arith.constant 0 : index
    %16 = vector.load %arg5[%c0_12, %c0_13] : memref<1x32xf32, #tpu.memory_space<vmem>>, vector<1x32xf32>
    tpu.vector_store %arg5[%c0_12, %c0_13], %15 {strides = array<i32>} : memref<1x32xf32, #tpu.memory_space<vmem>>, vector<1x32xf32>,
    %c0_14 = arith.constant 0 : index
    %c0_15 = arith.constant 0 : index
    %17 = vector.load %arg6[%c0_14, %c0_15] : memref<1x32xf32, #tpu.memory_space<vmem>>, vector<1x32xf32>
    %18 = arith.mulf %10, %10 : vector<32x32xf32>
    %cst_16 = arith.constant dense<0.000000e+00> : vector<32xf32>
    %19 = vector.multi_reduction <add>, %18, %cst_16 [0] : vector<32x32xf32> to vector<32xf32>
    %20 = vector.shape_cast %19 : vector<32xf32> to vector<1x32xf32>
    %21 = arith.addf %17, %20 : vector<1x32xf32>
    %c0_17 = arith.constant 0 : index
    %c0_18 = arith.constant 0 : index
    %22 = vector.load %arg6[%c0_17, %c0_18] : memref<1x32xf32, #tpu.memory_space<vmem>>, vector<1x32xf32>
    tpu.vector_store %arg6[%c0_17, %c0_18], %21 {strides = array<i32>} : memref<1x32xf32, #tpu.memory_space<vmem>>, vector<1x32xf32>,
    return
  }
  func.func @transform_0(%arg0: i32) -> (i32, i32) {
    %c0_i32 = arith.constant 0 : i32
    %c0_i32_0 = arith.constant 0 : i32
    return %arg0, %c0_i32 : i32, i32
  }
  func.func @transform_1(%arg0: i32) -> (i32, i32) {
    %c0_i32 = arith.constant 0 : i32
    %c0_i32_0 = arith.constant 0 : i32
    %c0_i32_1 = arith.constant 0 : i32
    return %c0_i32, %c0_i32_0 : i32, i32
  }
  func.func @transform_2(%arg0: i32) -> (i32, i32) {
    %c0_i32 = arith.constant 0 : i32
    %c0_i32_0 = arith.constant 0 : i32
    %c0_i32_1 = arith.constant 0 : i32
    return %c0_i32, %c0_i32_0 : i32, i32
  }
  func.func @transform_3(%arg0: i32) -> (i32, i32) {
    %c0_i32 = arith.constant 0 : i32
    %c0_i32_0 = arith.constant 0 : i32
    return %arg0, %c0_i32 : i32, i32
  }
  func.func @transform_4(%arg0: i32) -> (i32, i32) {
    %c0_i32 = arith.constant 0 : i32
    %c0_i32_0 = arith.constant 0 : i32
    %c0_i32_1 = arith.constant 0 : i32
    return %c0_i32, %c0_i32_0 : i32, i32
  }
  func.func @transform_5(%arg0: i32) -> (i32, i32) {
    %c0_i32 = arith.constant 0 : i32
    %c0_i32_0 = arith.constant 0 : i32
    %c0_i32_1 = arith.constant 0 : i32
    return %c0_i32, %c0_i32_0 : i32, i32
  }
}

module attributes {stable_mosaic.version = 11 : i64} {
  func.func @kernel(%arg0: i32, %arg1: memref<16x32xf32, #tpu.memory_space<vmem>>, %arg2: memref<16x32xf32, #tpu.memory_space<vmem>>, %arg3: memref<1x32xf32, #tpu.memory_space<vmem>>, %arg4: memref<1x32xf32, #tpu.memory_space<vmem>>, %arg5: memref<16x32xf32, #tpu.memory_space<vmem>>) attributes {dimension_semantics = [#tpu.dimension_semantics<parallel>], iteration_bounds = array<i64: 2>, scalar_prefetch = 0 : i64, scratch_operands = 0 : i64, tpu.core_type = #tpu.core_type<tc>, window_params = [{transform_indices = @transform_0, window_bounds = array<i64: 16, 32>}, {transform_indices = @transform_1, window_bounds = array<i64: 16, 32>}, {pipeline_mode = #tpu.pipeline_mode<synchronous>, transform_indices = @transform_2, window_bounds = array<i64: 1, 32>}, {pipeline_mode = #tpu.pipeline_mode<synchronous>, transform_indices = @transform_3, window_bounds = array<i64: 1, 32>}, {transform_indices = @transform_4, window_bounds = array<i64: 16, 32>}]} {
    %c0 = arith.constant 0 : index
    %c0_0 = arith.constant 0 : index
    %0 = vector.load %arg3[%c0, %c0_0] : memref<1x32xf32, #tpu.memory_space<vmem>>, vector<1x32xf32>
    %cst = arith.constant 1.562500e-02 : f32
    %1 = vector.broadcast %cst : f32 to vector<1x32xf32>
    %2 = arith.mulf %0, %1 : vector<1x32xf32>
    %c0_1 = arith.constant 0 : index
    %c0_2 = arith.constant 0 : index
    %3 = vector.load %arg4[%c0_1, %c0_2] : memref<1x32xf32, #tpu.memory_space<vmem>>, vector<1x32xf32>
    %cst_3 = arith.constant 1.562500e-02 : f32
    %4 = vector.broadcast %cst_3 : f32 to vector<1x32xf32>
    %5 = arith.mulf %3, %4 : vector<1x32xf32>
    %6 = arith.mulf %2, %2 : vector<1x32xf32>
    %7 = arith.subf %5, %6 : vector<1x32xf32>
    %cst_4 = arith.constant 9.99999974E-6 : f32
    %8 = vector.broadcast %cst_4 : f32 to vector<1x32xf32>
    %9 = arith.addf %7, %8 : vector<1x32xf32>
    %10 = math.rsqrt %9 : vector<1x32xf32>
    %c0_5 = arith.constant 0 : index
    %c0_6 = arith.constant 0 : index
    %11 = vector.load %arg1[%c0_5, %c0_6] : memref<16x32xf32, #tpu.memory_space<vmem>>, vector<16x32xf32>
    %12 = vector.broadcast %2 : vector<1x32xf32> to vector<16x32xf32>
    %13 = arith.subf %11, %12 : vector<16x32xf32>
    %14 = vector.broadcast %10 : vector<1x32xf32> to vector<16x32xf32>
    %15 = arith.mulf %13, %14 : vector<16x32xf32>
    %c0_7 = arith.constant 0 : index
    %c0_8 = arith.constant 0 : index
    %16 = vector.load %arg2[%c0_7, %c0_8] : memref<16x32xf32, #tpu.memory_space<vmem>>, vector<16x32xf32>
    %17 = vector.broadcast %2 : vector<1x32xf32> to vector<16x32xf32>
    %18 = arith.subf %16, %17 : vector<16x32xf32>
    %19 = vector.broadcast %10 : vector<1x32xf32> to vector<16x32xf32>
    %20 = arith.mulf %18, %19 : vector<16x32xf32>
    %21 = arith.maximumf %15, %20 : vector<16x32xf32>
    %c0_9 = arith.constant 0 : index
    %c0_10 = arith.constant 0 : index
    %22 = vector.load %arg5[%c0_9, %c0_10] : memref<16x32xf32, #tpu.memory_space<vmem>>, vector<16x32xf32>
    tpu.vector_store %arg5[%c0_9, %c0_10], %21 {strides = array<i32>} : memref<16x32xf32, #tpu.memory_space<vmem>>, vector<16x32xf32>,
    return
  }
  func.func @transform_0(%arg0: i32) -> (i32, i32) {
    %c0_i32 = arith.constant 0 : i32
    %c0_i32_0 = arith.constant 0 : i32
    return %arg0, %c0_i32 : i32, i32
  }
  func.func @transform_1(%arg0: i32) -> (i32, i32) {
    %c0_i32 = arith.constant 0 : i32
    %c0_i32_0 = arith.constant 0 : i32
    return %arg0, %c0_i32 : i32, i32
  }
  func.func @transform_2(%arg0: i32) -> (i32, i32) {
    %c0_i32 = arith.constant 0 : i32
    %c0_i32_0 = arith.constant 0 : i32
    %c0_i32_1 = arith.constant 0 : i32
    return %c0_i32, %c0_i32_0 : i32, i32
  }
  func.func @transform_3(%arg0: i32) -> (i32, i32) {
    %c0_i32 = arith.constant 0 : i32
    %c0_i32_0 = arith.constant 0 : i32
    %c0_i32_1 = arith.constant 0 : i32
    return %c0_i32, %c0_i32_0 : i32, i32
  }
  func.func @transform_4(%arg0: i32) -> (i32, i32) {
    %c0_i32 = arith.constant 0 : i32
    %c0_i32_0 = arith.constant 0 : i32
    return %arg0, %c0_i32 : i32, i32
  }
}

module attributes {stable_mosaic.version = 11 : i64} {
  func.func @_conv_bn_avgpool_fc_kernel(%arg0: i32, %arg1: memref<16x512xf32, #tpu.memory_space<vmem>>, %arg2: memref<512x64xf32, #tpu.memory_space<vmem>>, %arg3: memref<1x64xf32, #tpu.memory_space<vmem>>, %arg4: memref<2x16xf32, #tpu.memory_space<vmem>>, %arg5: memref<64x128xf32, #tpu.memory_space<vmem>>, %arg6: memref<1x128xf32, #tpu.memory_space<vmem>>, %arg7: memref<2x128xf32, #tpu.memory_space<vmem>>) attributes {dimension_semantics = [#tpu.dimension_semantics<arbitrary>], iteration_bounds = array<i64: 1>, scalar_prefetch = 0 : i64, scratch_operands = 0 : i64, tpu.core_type = #tpu.core_type<tc>, window_params = [{pipeline_mode = #tpu.pipeline_mode<synchronous>, transform_indices = @transform_0, window_bounds = array<i64: 16, 512>}, {pipeline_mode = #tpu.pipeline_mode<synchronous>, transform_indices = @transform_1, window_bounds = array<i64: 512, 64>}, {pipeline_mode = #tpu.pipeline_mode<synchronous>, transform_indices = @transform_2, window_bounds = array<i64: 1, 64>}, {pipeline_mode = #tpu.pipeline_mode<synchronous>, transform_indices = @transform_3, window_bounds = array<i64: 2, 16>}, {pipeline_mode = #tpu.pipeline_mode<synchronous>, transform_indices = @transform_4, window_bounds = array<i64: 64, 128>}, {pipeline_mode = #tpu.pipeline_mode<synchronous>, transform_indices = @transform_5, window_bounds = array<i64: 1, 128>}, {pipeline_mode = #tpu.pipeline_mode<synchronous>, transform_indices = @transform_6, window_bounds = array<i64: 2, 128>}]} {
    %c0 = arith.constant 0 : index
    %c0_0 = arith.constant 0 : index
    %0 = vector.load %arg1[%c0, %c0_0] : memref<16x512xf32, #tpu.memory_space<vmem>>, vector<16x512xf32>
    %c0_1 = arith.constant 0 : index
    %c0_2 = arith.constant 0 : index
    %1 = vector.load %arg2[%c0_1, %c0_2] : memref<512x64xf32, #tpu.memory_space<vmem>>, vector<512x64xf32>
    %cst = arith.constant dense<0.000000e+00> : vector<16x64xf32>
    %2 = tpu.matmul %0, %1, %cst {dimension_numbers = #tpu.dot_dimension_numbers<[1], [0], [0], [1], [0, 0, 1, 1], [], []>} : vector<16x512xf32>, vector<512x64xf32>, vector<16x64xf32> -> vector<16x64xf32>
    %c0_3 = arith.constant 0 : index
    %c0_4 = arith.constant 0 : index
    %3 = vector.load %arg3[%c0_3, %c0_4] : memref<1x64xf32, #tpu.memory_space<vmem>>, vector<1x64xf32>
    %4 = vector.broadcast %3 : vector<1x64xf32> to vector<16x64xf32>
    %5 = arith.addf %2, %4 : vector<16x64xf32>
    %cst_5 = arith.constant 0.000000e+00 : f32
    %6 = vector.broadcast %cst_5 : f32 to vector<16x64xf32>
    %7 = arith.maximumf %5, %6 : vector<16x64xf32>
    %cst_6 = arith.constant dense<0.000000e+00> : vector<64xf32>
    %8 = vector.multi_reduction <add>, %7, %cst_6 [0] : vector<16x64xf32> to vector<64xf32>
    %9 = vector.shape_cast %8 : vector<64xf32> to vector<1x64xf32>
    %10 = arith.mulf %7, %7 : vector<16x64xf32>
    %cst_7 = arith.constant dense<0.000000e+00> : vector<64xf32>
    %11 = vector.multi_reduction <add>, %10, %cst_7 [0] : vector<16x64xf32> to vector<64xf32>
    %12 = vector.shape_cast %11 : vector<64xf32> to vector<1x64xf32>
    %cst_8 = arith.constant 1.600000e+01 : f32
    %13 = vector.broadcast %cst_8 : f32 to vector<1x64xf32>
    %14 = arith.divf %9, %13 : vector<1x64xf32>
    %cst_9 = arith.constant 1.600000e+01 : f32
    %15 = vector.broadcast %cst_9 : f32 to vector<1x64xf32>
    %16 = arith.divf %12, %15 : vector<1x64xf32>
    %17 = arith.mulf %14, %14 : vector<1x64xf32>
    %18 = arith.subf %16, %17 : vector<1x64xf32>
    %19 = vector.broadcast %14 : vector<1x64xf32> to vector<16x64xf32>
    %20 = arith.subf %7, %19 : vector<16x64xf32>
    %cst_10 = arith.constant 9.99999974E-6 : f32
    %21 = vector.broadcast %cst_10 : f32 to vector<1x64xf32>
    %22 = arith.addf %18, %21 : vector<1x64xf32>
    %23 = math.rsqrt %22 : vector<1x64xf32>
    %24 = vector.broadcast %23 : vector<1x64xf32> to vector<16x64xf32>
    %25 = arith.mulf %20, %24 : vector<16x64xf32>
    %c0_11 = arith.constant 0 : index
    %c0_12 = arith.constant 0 : index
    %26 = vector.load %arg4[%c0_11, %c0_12] : memref<2x16xf32, #tpu.memory_space<vmem>>, vector<2x16xf32>
    %cst_13 = arith.constant dense<0.000000e+00> : vector<2x64xf32>
    %27 = tpu.matmul %26, %25, %cst_13 {dimension_numbers = #tpu.dot_dimension_numbers<[1], [0], [0], [1], [0, 0, 1, 1], [], []>} : vector<2x16xf32>, vector<16x64xf32>, vector<2x64xf32> -> vector<2x64xf32>
    %c0_14 = arith.constant 0 : index
    %c0_15 = arith.constant 0 : index
    %28 = vector.load %arg5[%c0_14, %c0_15] : memref<64x128xf32, #tpu.memory_space<vmem>>, vector<64x128xf32>
    %cst_16 = arith.constant dense<0.000000e+00> : vector<2x128xf32>
    %29 = tpu.matmul %27, %28, %cst_16 {dimension_numbers = #tpu.dot_dimension_numbers<[1], [0], [0], [1], [0, 0, 1, 1], [], []>} : vector<2x64xf32>, vector<64x128xf32>, vector<2x128xf32> -> vector<2x128xf32>
    %c0_17 = arith.constant 0 : index
    %c0_18 = arith.constant 0 : index
    %30 = vector.load %arg6[%c0_17, %c0_18] : memref<1x128xf32, #tpu.memory_space<vmem>>, vector<1x128xf32>
    %31 = vector.broadcast %30 : vector<1x128xf32> to vector<2x128xf32>
    %32 = arith.addf %29, %31 : vector<2x128xf32>
    %c0_19 = arith.constant 0 : index
    %c0_20 = arith.constant 0 : index
    %33 = vector.load %arg7[%c0_19, %c0_20] : memref<2x128xf32, #tpu.memory_space<vmem>>, vector<2x128xf32>
    tpu.vector_store %arg7[%c0_19, %c0_20], %32 {strides = array<i32>} : memref<2x128xf32, #tpu.memory_space<vmem>>, vector<2x128xf32>,
    return
  }
  func.func @transform_0(%arg0: i32) -> (i32, i32) {
    %c0_i32 = arith.constant 0 : i32
    %c0_i32_0 = arith.constant 0 : i32
    %c0_i32_1 = arith.constant 0 : i32
    return %c0_i32, %c0_i32_0 : i32, i32
  }
  func.func @transform_1(%arg0: i32) -> (i32, i32) {
    %c0_i32 = arith.constant 0 : i32
    %c0_i32_0 = arith.constant 0 : i32
    %c0_i32_1 = arith.constant 0 : i32
    return %c0_i32, %c0_i32_0 : i32, i32
  }
  func.func @transform_2(%arg0: i32) -> (i32, i32) {
    %c0_i32 = arith.constant 0 : i32
    %c0_i32_0 = arith.constant 0 : i32
    %c0_i32_1 = arith.constant 0 : i32
    return %c0_i32, %c0_i32_0 : i32, i32
  }
  func.func @transform_3(%arg0: i32) -> (i32, i32) {
    %c0_i32 = arith.constant 0 : i32
    %c0_i32_0 = arith.constant 0 : i32
    %c0_i32_1 = arith.constant 0 : i32
    return %c0_i32, %c0_i32_0 : i32, i32
  }
  func.func @transform_4(%arg0: i32) -> (i32, i32) {
    %c0_i32 = arith.constant 0 : i32
    %c0_i32_0 = arith.constant 0 : i32
    %c0_i32_1 = arith.constant 0 : i32
    return %c0_i32, %c0_i32_0 : i32, i32
  }
  func.func @transform_5(%arg0: i32) -> (i32, i32) {
    %c0_i32 = arith.constant 0 : i32
    %c0_i32_0 = arith.constant 0 : i32
    %c0_i32_1 = arith.constant 0 : i32
    return %c0_i32, %c0_i32_0 : i32, i32
  }
  func.func @transform_6(%arg0: i32) -> (i32, i32) {
    %c0_i32 = arith.constant 0 : i32
    %c0_i32_0 = arith.constant 0 : i32
    %c0_i32_1 = arith.constant 0 : i32
    return %c0_i32, %c0_i32_0 : i32, i32
  }
}

</mosaic_0001>

<bundles_post_ra>
// kernel: vibration_encoder_forward.6
= control target key start
LH: loop header
LB: loop body
LE: loop exit
PB: predicated region body
PF: predicated region fallthrough
CT: control target
= control target key end

     0   :  { %s432_s15 = smov 0   ;;  %s471_s0 = inlined_call_operand.vmem [shape: f32[128,16], index: 0, kind: input, shape index: {}]   ;;  %s472_s1 = inlined_call_operand.vmem [shape: f32[128,16], index: 1, kind: input, shape index: {}]   ;;  %s473_s2 = inlined_call_operand.vmem [shape: f32[1,16], index: 2, kind: input, shape index: {}]   ;;  %s474_s3 = inlined_call_operand.vmem [shape: f32[1,16], index: 3, kind: input, shape index: {}]   ;;  %s475_s4 = inlined_call_operand.vmem [shape: f32[128,16], index: 4, kind: output, shape index: {}]  }
   0x1 LB: > { %s376_s16 = sadd.s32 4294967295, %s405_s15   ;;  %p380_p0 = scmp.ge.s32.totalorder %s405_s15, 1  ;;  %s405_s15 = sphi %s432_s15, %s14_s15  }
   0x2   : > { %p174_p1 = scmp.lt.s32.totalorder %s405_s15, 3 }
   0x4   : > { %p175_p2 = pnand %p380_p0, %p174_p1 }
   0x5   : > { %s381_s17 = sshll.u32 (!%p175_p2), %s376_s16, 3  ;;  %v223_v0 = vld [vmem:[%s473_s2] sm:$0x1] (!%p175_p2)  ;;  %v240_v4 = vlaneseq (!%p175_p2)  ;;  %vm299_vm0 = vcmask (!%p175_p2), 130048  }
   0x6   : > { %178 = sbr.rel (%p175_p2) target bundleno = 37 (0x25), region = 36  ;;  %v225_v1 = vld [vmem:[%s474_s3] sm:$0x1] (!%p175_p2)  ;;  %p206_p3 = scmp.lt.s32.totalorder (!%p175_p2), %s381_s17, 15  ;;  %v224_v2 = vmul.f32 (!%p175_p2), 0.00390625, %v223_v0 }
   0x7   : > { %v226_v3 = vmul.f32 (!%p175_p2), 0.00390625, %v225_v1  ;;  %v241_v7 = vshrl.u32 (!%p175_p2), %v240_v4, 7 }
   0x8   : > { %v227_v5 = vmul.f32 (!%p175_p2), %v224_v2, %v224_v2 }
   0x9   : > { %v242_v9 = vsub.s32 (!%p175_p2), 0, %v241_v7 }
   0xa   : > { %v228_v6 = vsub.f32 (!%p175_p2), %v226_v3, %v227_v5 }
   0xb   : > { %v243_v11 = vrot.slane (!%p175_p2), %v224_v2, %v242_v9 }
   0xc   : > { %v229_v8 = vadd.f32 (!%p175_p2), 1e-05, %v228_v6 }
   0xd   : > { %s477_s17 = smov (!%p206_p3, %s381_s17), 15 }
   0xe   : > { %s446_s22 = sshll.u32 %s477_s17, 3  ;;  %397 = vrsqrt.f32 %v229_v8 }
   0xf   : > { %s209_s25 = scalar_lea.vmem %s471_s0, %s446_s22  ;;  %s215_s28 = scalar_lea.vmem %s472_s1, %s446_s22 }
  0x10   : > { %v231_v10 = vld [vmem:[%s209_s25] sm:$0xff]  ;;  %v232_v13 = vld [vmem:[%s209_s25 + $0x8] sm:$0xff]  ;;  %v233_v15 = vld [vmem:[%s209_s25 + $0x10] sm:$0xff]  ;;  %s221_s5 = scalar_lea.vmem %s475_s4, %s446_s22 }
  0x11   : > { %v267_v12 = vld [vmem:[%s215_s28] sm:$0xff]  ;;  %v268_v14 = vld [vmem:[%s215_s28 + $0x8] sm:$0xff]  ;;  %v269_v16 = vld [vmem:[%s215_s28 + $0x10] sm:$0xff]  ;;  %v245_v21 = vsub.f32 %v231_v10, %v243_v11  ;;  %v246_v26 = vsub.f32 %v232_v13, %v243_v11  ;;  %v247_v28 = vsub.f32 %v233_v15, %v243_v11 }
  0x12   : > { %v234_v17 = vld [vmem:[%s209_s25 + $0x18] sm:$0xff]  ;;  %v235_v19 = vld [vmem:[%s209_s25 + $0x20] sm:$0xff]  ;;  %v236_v22 = vld [vmem:[%s209_s25 + $0x28] sm:$0xff]  ;;  %v275_v25 = vsub.f32 %v267_v12, %v243_v11  ;;  %v276_v27 = vsub.f32 %v268_v14, %v243_v11  ;;  %v277_v33 = vsub.f32 %v269_v16, %v243_v11 }
  0x13   : > { %v270_v18 = vld [vmem:[%s215_s28 + $0x18] sm:$0xff]  ;;  %v271_v20 = vld [vmem:[%s215_s28 + $0x20] sm:$0xff]  ;;  %v272_v23 = vld [vmem:[%s215_s28 + $0x28] sm:$0xff]  ;;  %v248_v34 = vsub.f32 %v234_v17, %v243_v11  ;;  %v249_v36 = vsub.f32 %v235_v19, %v243_v11  ;;  %v250_v39 = vsub.f32 %v236_v22, %v243_v11 }
  0x14   : > { %v237_v24 = vld [vmem:[%s209_s25 + $0x30] sm:$0xff]  ;;  %v238_v30 = vld [vmem:[%s209_s25 + $0x38] sm:$0xff]  ;;  %v278_v35 = vsub.f32 %v270_v18, %v243_v11  ;;  %v279_v38 = vsub.f32 %v271_v20, %v243_v11  ;;  %v280_v40 = vsub.f32 %v272_v23, %v243_v11 }
  0x15   : > { %v273_v29 = vld [vmem:[%s215_s28 + $0x30] sm:$0xff]  ;;  %v274_v31 = vld [vmem:[%s215_s28 + $0x38] sm:$0xff]  ;;  %v251_v41 = vsub.f32 %v237_v24, %v243_v11  ;;  %v252_v43 = vsub.f32 %v238_v30, %v243_v11 }
  0x16   : > { %v281_v42 = vsub.f32 %v273_v29, %v243_v11  ;;  %v282_v44 = vsub.f32 %v274_v31, %v243_v11 }
  0x18   : > { %v398_v32 = vpop.eup %397 }
  0x19   : > { %v257_v37 = vrot.slane %v398_v32, %v242_v9 }
  0x1b   : > { %v259_v45 = vmul.f32 %v257_v37, %v245_v21  ;;  %v283_v46 = vmul.f32 %v275_v25, %v257_v37  ;;  %v260_v47 = vmul.f32 %v257_v37, %v246_v26  ;;  %v284_v48 = vmul.f32 %v276_v27, %v257_v37 }
  0x1c   : > { %v261_v49 = vmul.f32 %v257_v37, %v247_v28  ;;  %v285_v50 = vmul.f32 %v277_v33, %v257_v37  ;;  %v262_v51 = vmul.f32 %v257_v37, %v248_v34  ;;  %v286_v52 = vmul.f32 %v278_v35, %v257_v37 }
  0x1d   : > { %v291_v53 = vmax.f32 %v259_v45, %v283_v46  ;;  %v292_v54 = vmax.f32 %v260_v47, %v284_v48  ;;  %v263_v55 = vmul.f32 %v257_v37, %v249_v36  ;;  %v287_v56 = vmul.f32 %v279_v38, %v257_v37 }
  0x1e   : > { %v293_v57 = vmax.f32 %v261_v49, %v285_v50  ;;  %v294_v58 = vmax.f32 %v262_v51, %v286_v52  ;;  %v264_v59 = vmul.f32 %v257_v37, %v250_v39  ;;  %v288_v60 = vmul.f32 %v280_v40, %v257_v37 }
  0x1f   : > { %300 = vst.msk [vmem:[%s221_s5] sm:$0xff] %vm299_vm0, %v291_v53  ;;  %301 = vst.msk [vmem:[%s221_s5 + $0x8] sm:$0xff] %vm299_vm0, %v292_v54  ;;  %v295_v61 = vmax.f32 %v263_v55, %v287_v56  ;;  %v265_v62 = vmul.f32 %v257_v37, %v251_v41  ;;  %v289_v63 = vmul.f32 %v281_v42, %v257_v37 }
  0x20   : > { %v266_v0 = vmul.f32 %v257_v37, %v252_v43  ;;  %302 = vst.msk [vmem:[%s221_s5 + $0x10] sm:$0xff] %vm299_vm0, %v293_v57  ;;  %303 = vst.msk [vmem:[%s221_s5 + $0x18] sm:$0xff] %vm299_vm0, %v294_v58  ;;  %v296_v1 = vmax.f32 %v264_v59, %v288_v60  ;;  %v290_v2 = vmul.f32 %v282_v44, %v257_v37 }
  0x21   : > { %304 = vst.msk [vmem:[%s221_s5 + $0x20] sm:$0xff] %vm299_vm0, %v295_v61  ;;  %v297_v3 = vmax.f32 %v265_v62, %v289_v63 }
  0x22   : > { %305 = vst.msk [vmem:[%s221_s5 + $0x28] sm:$0xff] %vm299_vm0, %v296_v1  ;;  %v298_v4 = vmax.f32 %v266_v0, %v290_v2 }
  0x23   : > { %306 = vst.msk [vmem:[%s221_s5 + $0x30] sm:$0xff] %vm299_vm0, %v297_v3 }
  0x24   : > { %307 = vst.msk [vmem:[%s221_s5 + $0x38] sm:$0xff] %vm299_vm0, %v298_v4 }
  0x25 PF: > { %s14_s15 = sadd.s32 1, %s405_s15  }
  0x26   : > { %p11_p4 = scmp.ge.s32.totalorder %s14_s15, 4  }
  0x28   :  { %13 = sbr.rel (!%p11_p4) target bundleno = 1 (0x1), region = 69 }

// kernel: vibration_encoder_forward.5
= control target key start
LH: loop header
LB: loop body
LE: loop exit
PB: predicated region body
PF: predicated region fallthrough
CT: control target
= control target key end

     0   :  { %s818_s18 = smov 0   ;;  %s1010_s0 = inlined_call_operand.vmem [shape: f32[256,64], index: 0, kind: input, shape index: {}]   ;;  %s1011_s1 = inlined_call_operand.vmem [shape: f32[64,16], index: 1, kind: input, shape index: {}]   ;;  %s1012_s2 = inlined_call_operand.vmem [shape: f32[1,16], index: 2, kind: input, shape index: {}]   ;;  %s1013_s3 = inlined_call_operand.vmem [shape: f32[256,16], index: 3, kind: output, shape index: {0}]   ;;  %s1014_s4 = inlined_call_operand.vmem [shape: f32[1,16], index: 4, kind: output, shape index: {1}]   ;;  %s1015_s5 = inlined_call_operand.vmem [shape: f32[1,16], index: 5, kind: output, shape index: {2}]  }
   0x1 LB: > { %s653_s19 = sadd.s32 4294967295, %s785_s18   ;;  %p657_p0 = scmp.ge.s32.totalorder %s785_s18, 1  ;;  %s785_s18 = sphi %s818_s18, %s16_s18  }
   0x2   : > { %p183_p1 = scmp.lt.s32.totalorder %s785_s18, 3 }
   0x4   : > { %p184_p2 = pnand %p657_p0, %p183_p1 }
   0x5   : > { %s658_s20 = sshll.u32 (!%p184_p2), %s653_s19, 4  ;;  %p662_p4 = scmp.ne.s32.totalorder (!%p184_p2), %s653_s19, 0 }
   0x6   : > { %187 = sbr.rel (%p184_p2) target bundleno = 306 (0x132), region = 32  ;;  %p212_p3 = scmp.lt.s32.totalorder (!%p184_p2), %s658_s20, 31 }
   0xd   : > { %s1017_s20 = smov (!%p212_p3, %s658_s20), 31  ;;  %226 = sbr.rel (%p662_p4) target bundleno = 20 (0x14), region = 36 }
   0xe   : > { %s659_s21 = sshll.u32 %s1017_s20, 3  ;;  %vm227_vm0 = vcmask (!%p662_p4), 122880   ;;  %v787_v0 = vmov (!%p662_p4), 0.0  }
   0xf   : > { %s829_s24 = scalar_lea.vmem %s1010_s0, %s659_s21  ;;  %s834_s27 = scalar_lea.vmem %s1013_s3, %s659_s21  ;;  %228 = vst.msk [vmem:[%s1014_s4] sm:$0x1] (!%p662_p4), %vm227_vm0, %v787_v0  ;;  %229 = vst.msk [vmem:[%s1015_s5] sm:$0x1] (!%p662_p4), %vm227_vm0, %v787_v0 }
  0x14 PF: > { %v246_v1 = vld [vmem:[%s1011_s1] sm:$0xff]  ;;  %v247_v2 = vld [vmem:[%s1011_s1 + $0x8] sm:$0xff]  ;;  %v248_v3 = vld [vmem:[%s1011_s1 + $0x10] sm:$0xff]  ;;  %vm261_vm1 = vcmask 523264   ;;  %vm471_vm2 = vcmask 130048   ;;  %vm527_vm3 = vcmask 122880  }
  0x15   : > { %v746_v4 = vpack.c.bf16 %v247_v2, %v246_v1  ;;  %v249_v5 = vld [vmem:[%s1011_s1 + $0x18] sm:$0xff]  ;;  %v250_v7 = vld [vmem:[%s1011_s1 + $0x20] sm:$0xff]  ;;  %v251_v8 = vld [vmem:[%s1011_s1 + $0x28] sm:$0xff] }
  0x16   : > { %v750_v6 = vpack.c.bf16 %v249_v5, %v248_v3  ;;  %v230_v9 = vld [vmem:[%s829_s24] sm:$0xff]  ;;  %v754_v10 = vpack.c.bf16 %v251_v8, %v250_v7  ;;  %v252_v12 = vld [vmem:[%s1011_s1 + $0x30] sm:$0xff]  ;;  %v253_v13 = vld [vmem:[%s1011_s1 + $0x38] sm:$0xff] }
  0x17   : > { %747 = vmatprep.subr.bf16.mxu0 %v746_v4  ;;  %762 = vmatprep.subr.bf16.mxu1 %v746_v4  ;;  %v238_v11 = vld [vmem:[%s829_s24 + $0x40] sm:$0xff]  ;;  %v758_v14 = vpack.c.bf16 %v253_v13, %v252_v12  ;;  %v231_v15 = vld [vmem:[%s829_s24 + $0x8] sm:$0xff]  ;;  %v232_v16 = vld [vmem:[%s829_s24 + $0x10] sm:$0xff] }
  0x18   : > { %749 = vmatpush3.bf16.msra.mxu0 %v746_v4  ;;  %722 = vmatprep.mubr.msk.f32.mxu0 %vm261_vm1, %v230_v9  ;;  %v239_v17 = vld [vmem:[%s829_s24 + $0x48] sm:$0xff]  ;;  %v240_v18 = vld [vmem:[%s829_s24 + $0x50] sm:$0xff]  ;;  %v233_v19 = vld [vmem:[%s829_s24 + $0x18] sm:$0xff] }
  0x19   : > { %751 = vmatprep.subr.bf16.mxu0 %v750_v6  ;;  %766 = vmatpush3.bf16.msra.mxu1 %v746_v4  ;;  %v234_v20 = vld [vmem:[%s829_s24 + $0x20] sm:$0xff]  ;;  %v241_v21 = vld [vmem:[%s829_s24 + $0x58] sm:$0xff]  ;;  %v235_v23 = vld [vmem:[%s829_s24 + $0x28] sm:$0xff] }
  0x1a   : > { %763 = vmatprep.subr.bf16.mxu1 %v750_v6  ;;  %734 = vmatprep.mubr.msk.f32.mxu1 %vm261_vm1, %v238_v11  ;;  %v242_v22 = vld [vmem:[%s829_s24 + $0x60] sm:$0xff]  ;;  %v236_v24 = vld [vmem:[%s829_s24 + $0x30] sm:$0xff]  ;;  %v243_v25 = vld [vmem:[%s829_s24 + $0x68] sm:$0xff] }
  0x1b   : > { %v244_v26 = vld [vmem:[%s829_s24 + $0x70] sm:$0xff]  ;;  %v237_v27 = vld [vmem:[%s829_s24 + $0x38] sm:$0xff]  ;;  %v901_v29 = vld [vmem:[%s1012_s2] ss:$0 sm:$0xff] }
  0x1c   : > { %753 = vmatpush3.bf16.msra.mxu0 %v750_v6  ;;  %v245_v28 = vld [vmem:[%s829_s24 + $0x78] sm:$0xff] }
  0x1d   : > { %755 = vmatprep.subr.bf16.mxu0 %v754_v10  ;;  %767 = vmatpush3.bf16.msra.mxu1 %v750_v6 }
  0x1e   : > { %764 = vmatprep.subr.bf16.mxu1 %v754_v10 }
  0x20   : > { %757 = vmatpush3.bf16.msra.mxu0 %v754_v10 }
  0x21   : > { %759 = vmatprep.subr.bf16.mxu0 %v758_v14  ;;  %768 = vmatpush3.bf16.msra.mxu1 %v754_v10 }
  0x22   : > { %765 = vmatprep.subr.bf16.mxu1 %v758_v14 }
  0x24   : > { %761 = vmatpush3.bf16.msra.mxu0 %v758_v14 }
  0x25   : > { %769 = vmatpush3.bf16.msra.mxu1 %v758_v14 }
  0x27   : > { %723 = vmatmul.mubr.msk.f32.vlgmr.msra.gmra.mrb[0].mxu0 %vm261_vm1, %v231_v15 }
  0x28   : > { %725 = vmatprep.mubr.msk.f32.mxu0 %vm261_vm1, %v232_v16  ;;  %735 = vmatmul.mubr.msk.f32.vlgmr.msra.gmra.mrb[0].mxu1 %vm261_vm1, %v239_v17 }
  0x29   : > { %737 = vmatprep.mubr.msk.f32.mxu1 %vm261_vm1, %v240_v18 }
  0x2b   : > { %726 = vmatmul.mubr.msk.f32.gmra.mrb[2].mxu0 %vm261_vm1, %v233_v19 }
  0x2c   : > { %728 = vmatprep.mubr.msk.f32.mxu0 %vm261_vm1, %v234_v20  ;;  %738 = vmatmul.mubr.msk.f32.gmra.mrb[2].mxu1 %vm261_vm1, %v241_v21 }
  0x2d   : > { %740 = vmatprep.mubr.msk.f32.mxu1 %vm261_vm1, %v242_v22 }
  0x2f   : > { %729 = vmatmul.mubr.msk.f32.gmra.mrb[4].mxu0 %vm261_vm1, %v235_v23 }
  0x30   : > { %731 = vmatprep.mubr.msk.f32.mxu0 %vm261_vm1, %v236_v24  ;;  %741 = vmatmul.mubr.msk.f32.gmra.mrb[4].mxu1 %vm261_vm1, %v243_v25 }
  0x31   : > { %743 = vmatprep.mubr.msk.f32.mxu1 %vm261_vm1, %v244_v26 }
  0x33   : > { %732 = vmatmul.mubr.msk.f32.gmra.mrb[6].mxu0 %vm261_vm1, %v237_v27 }
  0x34   : > { %744 = vmatmul.mubr.msk.f32.gmra.mrb[6].mxu1 %vm261_vm1, %v245_v28 }
  0xfa   : > { %v724_v30 = vpop.f32.mrb[0].mxu0 }
  0xfb   : > { %v382_v31 = vadd.f32 %v724_v30, %v901_v29  ;;  %v376_v32 = vpop.f32.mrb[1].mxu0  ;;  %v736_v33 = vpop.f32.mrb[0].mxu1 }
  0xfc   : > { %v377_v34 = vadd.f32 %v901_v29, %v376_v32  ;;  %v422_v35 = vadd.f32 %v736_v33, %v901_v29  ;;  %v416_v36 = vpop.f32.mrb[1].mxu1 }
  0xfd   : > { %v456_v37 = vmax.f32 %v382_v31, 0.0  ;;  %v417_v38 = vadd.f32 %v901_v29, %v416_v36 }
  0xfe   : > { %v455_v39 = vmax.f32 %v377_v34, 0.0  ;;  %v727_v40 = vpop.f32.mrb[2].mxu0  ;;  %v907_v41 = vmax.f32 %v422_v35, 0.0 }
  0xff   : > { %473 = vst.msk [vmem:[%s834_s27 + $0x8] sm:$0xff] %vm471_vm2, %v456_v37  ;;  %v490_v42 = vsel %vm471_vm2, %v456_v37, 0.0  ;;  %v531_v43 = vmul.f32 %v456_v37, %v456_v37  ;;  %v392_v44 = vadd.f32 %v727_v40, %v901_v29  ;;  %v386_v45 = vpop.f32.mrb[3].mxu0  ;;  %v913_v46 = vmax.f32 %v417_v38, 0.0  ;;  %v739_v47 = vpop.f32.mrb[2].mxu1 }
 0x100   : > { %472 = vst.msk [vmem:[%s834_s27] sm:$0xff] %vm471_vm2, %v455_v39  ;;  %v489_v48 = vsel %vm471_vm2, %v455_v39, 0.0  ;;  %v530_v49 = vmul.f32 %v455_v39, %v455_v39  ;;  %v387_v50 = vadd.f32 %v901_v29, %v386_v45  ;;  %481 = vst.msk [vmem:[%s834_s27 + $0x48] sm:$0xff] %vm471_vm2, %v907_v41  ;;  %v426_v51 = vpop.f32.mrb[3].mxu1  ;;  %v432_v10 = vadd.f32 %v739_v47, %v901_v29 }
 0x101   : > { %v547_v52 = vsel %vm471_vm2, %v531_v43, 0.0  ;;  %v491_v53 = vadd.f32 %v490_v42, %v489_v48  ;;  %v458_v54 = vmax.f32 %v392_v44, 0.0  ;;  %480 = vst.msk [vmem:[%s834_s27 + $0x40] sm:$0xff] %vm471_vm2, %v913_v46  ;;  %v538_v6 = vmul.f32 %v913_v46, %v913_v46 }
 0x102   : > { %v546_v55 = vsel %vm471_vm2, %v530_v49, 0.0  ;;  %v457_v56 = vmax.f32 %v387_v50, 0.0  ;;  %v730_v57 = vpop.f32.mrb[4].mxu0  ;;  %v427_v11 = vadd.f32 %v901_v29, %v426_v51  ;;  %v466_v26 = vmax.f32 %v432_v10, 0.0 }
 0x103   : > { %v548_v58 = vadd.f32 %v547_v52, %v546_v55  ;;  %475 = vst.msk [vmem:[%s834_s27 + $0x18] sm:$0xff] %vm471_vm2, %v458_v54  ;;  %v533_v59 = vmul.f32 %v458_v54, %v458_v54  ;;  %v402_v60 = vadd.f32 %v730_v57, %v901_v29  ;;  %v396_v61 = vpop.f32.mrb[5].mxu0  ;;  %v742_v62 = vpop.f32.mrb[4].mxu1  ;;  %v494_v3 = vsel %vm471_vm2, %v458_v54, 0.0 }
 0x104   : > { %474 = vst.msk [vmem:[%s834_s27 + $0x10] sm:$0xff] %vm471_vm2, %v457_v56  ;;  %v492_v63 = vsel %vm471_vm2, %v457_v56, 0.0  ;;  %v532_v0 = vmul.f32 %v457_v56, %v457_v56  ;;  %v397_v1 = vadd.f32 %v901_v29, %v396_v61  ;;  %v436_v2 = vpop.f32.mrb[5].mxu1  ;;  %v465_v31 = vmax.f32 %v427_v11, 0.0  ;;  %483 = vst.msk [vmem:[%s834_s27 + $0x58] sm:$0xff] %vm471_vm2, %v466_v26 }
 0x105   : > { %v493_v4 = vadd.f32 %v492_v63, %v491_v53  ;;  %v460_v5 = vmax.f32 %v402_v60, 0.0  ;;  %v551_v12 = vsel %vm471_vm2, %v533_v59, 0.0  ;;  %v539_v40 = vmul.f32 %v907_v41, %v907_v41 }
 0x106   : > { %v549_v7 = vsel %vm471_vm2, %v532_v0, 0.0  ;;  %v459_v8 = vmax.f32 %v397_v1, 0.0  ;;  %v733_v9 = vpop.f32.mrb[6].mxu0  ;;  %482 = vst.msk [vmem:[%s834_s27 + $0x50] sm:$0xff] %vm471_vm2, %v465_v31  ;;  %v504_v42 = vsel %vm471_vm2, %v913_v46, 0.0  ;;  %v561_v45 = vsel %vm471_vm2, %v538_v6, 0.0 }
 0x107   : > { %v550_v13 = vadd.f32 %v549_v7, %v548_v58  ;;  %477 = vst.msk [vmem:[%s834_s27 + $0x28] sm:$0xff] %vm471_vm2, %v460_v5  ;;  %v535_v14 = vmul.f32 %v460_v5, %v460_v5  ;;  %v495_v15 = vadd.f32 %v494_v3, %v493_v4  ;;  %v406_v16 = vpop.f32.mrb[7].mxu0  ;;  %v745_v17 = vpop.f32.mrb[6].mxu1  ;;  %v412_v20 = vadd.f32 %v733_v9, %v901_v29 }
 0x108   : > { %476 = vst.msk [vmem:[%s834_s27 + $0x20] sm:$0xff] %vm471_vm2, %v459_v8  ;;  %v496_v18 = vsel %vm471_vm2, %v459_v8, 0.0  ;;  %v534_v19 = vmul.f32 %v459_v8, %v459_v8  ;;  %v407_v21 = vadd.f32 %v901_v29, %v406_v16  ;;  %v446_v22 = vpop.f32.mrb[7].mxu1  ;;  %v498_v23 = vsel %vm471_vm2, %v460_v5, 0.0 }
 0x109   : > { %v497_v24 = vadd.f32 %v496_v18, %v495_v15  ;;  %v552_v25 = vadd.f32 %v551_v12, %v550_v13  ;;  %v462_v28 = vmax.f32 %v412_v20, 0.0  ;;  %v555_v34 = vsel %vm471_vm2, %v535_v14, 0.0 }
 0x10a   : > { %v553_v27 = vsel %vm471_vm2, %v534_v19, 0.0  ;;  %v461_v30 = vmax.f32 %v407_v21, 0.0  ;;  %v442_v47 = vadd.f32 %v742_v62, %v901_v29  ;;  %v437_v50 = vadd.f32 %v901_v29, %v436_v2 }
 0x10b   : > { %v554_v32 = vadd.f32 %v553_v27, %v552_v25  ;;  %v499_v33 = vadd.f32 %v498_v23, %v497_v24  ;;  %479 = vst.msk [vmem:[%s834_s27 + $0x38] sm:$0xff] %vm471_vm2, %v462_v28  ;;  %v537_v35 = vmul.f32 %v462_v28, %v462_v28  ;;  %v502_v43 = vsel %vm471_vm2, %v462_v28, 0.0 }
 0x10c   : > { %478 = vst.msk [vmem:[%s834_s27 + $0x30] sm:$0xff] %vm471_vm2, %v461_v30  ;;  %v500_v36 = vsel %vm471_vm2, %v461_v30, 0.0  ;;  %v536_v37 = vmul.f32 %v461_v30, %v461_v30  ;;  %v452_v51 = vadd.f32 %v745_v17, %v901_v29  ;;  %v540_v46 = vmul.f32 %v465_v31, %v465_v31 }
 0x10d   : > { %v501_v38 = vadd.f32 %v500_v36, %v499_v33  ;;  %v556_v39 = vadd.f32 %v555_v34, %v554_v32  ;;  %v559_v52 = vsel %vm471_vm2, %v537_v35, 0.0  ;;  %v468_v53 = vmax.f32 %v442_v47, 0.0 }
 0x10e   : > { %v557_v44 = vsel %vm471_vm2, %v536_v37, 0.0  ;;  %v447_v54 = vadd.f32 %v901_v29, %v446_v22  ;;  %v467_v57 = vmax.f32 %v437_v50, 0.0  ;;  %v470_v58 = vmax.f32 %v452_v51, 0.0 }
 0x10f   : > { %v558_v48 = vadd.f32 %v557_v44, %v556_v39  ;;  %v503_v49 = vadd.f32 %v502_v43, %v501_v38  ;;  %v506_v59 = vsel %vm471_vm2, %v907_v41, 0.0  ;;  %v508_v60 = vsel %vm471_vm2, %v465_v31, 0.0  ;;  %485 = vst.msk [vmem:[%s834_s27 + $0x68] sm:$0xff] %vm471_vm2, %v468_v53  ;;  %v488_v38 = vld [vmem:[%s1014_s4] sm:$0x1] }
 0x110   : > { %v469_v61 = vmax.f32 %v447_v54, 0.0  ;;  %484 = vst.msk [vmem:[%s834_s27 + $0x60] sm:$0xff] %vm471_vm2, %v467_v57  ;;  %487 = vst.msk [vmem:[%s834_s27 + $0x78] sm:$0xff] %vm471_vm2, %v470_v58  ;;  %v563_v29 = vsel %vm471_vm2, %v539_v40, 0.0  ;;  %v541_v0 = vmul.f32 %v466_v26, %v466_v26  ;;  %v565_v1 = vsel %vm471_vm2, %v540_v46, 0.0 }
 0x111   : > { %v505_v55 = vadd.f32 %v504_v42, %v503_v49  ;;  %v560_v56 = vadd.f32 %v559_v52, %v558_v48  ;;  %v542_v2 = vmul.f32 %v467_v57, %v467_v57  ;;  %v510_v4 = vsel %vm471_vm2, %v466_v26, 0.0  ;;  %v529_v42 = vld [vmem:[%s1015_s5] sm:$0x1] }
 0x112   : > { %486 = vst.msk [vmem:[%s834_s27 + $0x70] sm:$0xff] %vm471_vm2, %v469_v61  ;;  %v512_v5 = vsel %vm471_vm2, %v467_v57, 0.0  ;;  %v567_v8 = vsel %vm471_vm2, %v541_v0, 0.0  ;;  %v543_v9 = vmul.f32 %v468_v53, %v468_v53  ;;  %v544_v11 = vmul.f32 %v469_v61, %v469_v61 }
 0x113   : > { %v562_v62 = vadd.f32 %v561_v45, %v560_v56  ;;  %v507_v63 = vadd.f32 %v506_v59, %v505_v55  ;;  %v569_v10 = vsel %vm471_vm2, %v542_v2, 0.0  ;;  %v514_v14 = vsel %vm471_vm2, %v468_v53, 0.0 }
 0x114   : > { %v516_v15 = vsel %vm471_vm2, %v469_v61, 0.0  ;;  %v571_v18 = vsel %vm471_vm2, %v543_v9, 0.0  ;;  %v545_v19 = vmul.f32 %v470_v58, %v470_v58  ;;  %v573_v20 = vsel %vm471_vm2, %v544_v11, 0.0 }
 0x115   : > { %v509_v41 = vadd.f32 %v508_v60, %v507_v63  ;;  %v564_v3 = vadd.f32 %v563_v29, %v562_v62  ;;  %v518_v23 = vsel %vm471_vm2, %v470_v58, 0.0 }
 0x116   : > { %v575_v26 = vsel %vm471_vm2, %v545_v19, 0.0 }
 0x117   : > { %v566_v6 = vadd.f32 %v565_v1, %v564_v3  ;;  %v511_v7 = vadd.f32 %v510_v4, %v509_v41 }
 0x119   : > { %v513_v12 = vadd.f32 %v512_v5, %v511_v7  ;;  %v568_v13 = vadd.f32 %v567_v8, %v566_v6 }
 0x11b   : > { %v570_v16 = vadd.f32 %v569_v10, %v568_v13  ;;  %v515_v17 = vadd.f32 %v514_v14, %v513_v12 }
 0x11d   : > { %v517_v21 = vadd.f32 %v516_v15, %v515_v17  ;;  %v572_v22 = vadd.f32 %v571_v18, %v570_v16 }
 0x11f   : > { %v519_v24 = vadd.f32 %v518_v23, %v517_v21  ;;  %v574_v25 = vadd.f32 %v573_v20, %v572_v22 }
 0x121   : > { %v520_v27 = vrot.slane %v519_v24, 4  ;;  %v576_v28 = vadd.f32 %v575_v26, %v574_v25 }
 0x123   : > { %v521_v30 = vadd.f32 %v520_v27, %v519_v24  ;;  %v577_v31 = vrot.slane %v576_v28, 4 }
 0x125   : > { %v522_v32 = vrot.slane %v521_v30, 2  ;;  %v578_v33 = vadd.f32 %v577_v31, %v576_v28 }
 0x127   : > { %v523_v34 = vadd.f32 %v522_v32, %v521_v30  ;;  %v579_v35 = vrot.slane %v578_v33, 2 }
 0x129   : > { %v524_v36 = vrot.slane %v523_v34, 1  ;;  %v580_v37 = vadd.f32 %v579_v35, %v578_v33 }
 0x12b   : > { %v525_v39 = vadd.f32 %v524_v36, %v523_v34  ;;  %v581_v40 = vrot.slane %v580_v37, 1 }
 0x12d   : > { %v526_v43 = vadd.f32 %v525_v39, %v488_v38  ;;  %v582_v44 = vadd.f32 %v581_v40, %v580_v37 }
 0x12f   : > { %528 = vst.msk [vmem:[%s1014_s4] sm:$0x1] %vm527_vm3, %v526_v43  ;;  %v583_v45 = vadd.f32 %v582_v44, %v529_v42 }
 0x131   : > { %584 = vst.msk [vmem:[%s1015_s5] sm:$0x1] %vm527_vm3, %v583_v45 }
 0x132 PF: > { %s16_s18 = sadd.s32 1, %s785_s18  }
 0x133   : > { %p13_p5 = scmp.ge.s32.totalorder %s16_s18, 4  }
 0x135   :  { %15 = sbr.rel (!%p13_p5) target bundleno = 1 (0x1), region = 82 }

// kernel: vibration_encoder_forward.8
= control target key start
LH: loop header
LB: loop body
LE: loop exit
PB: predicated region body
PF: predicated region fallthrough
CT: control target
= control target key end

     0   :  { %s384_s15 = smov 0   ;;  %s410_s0 = inlined_call_operand.vmem [shape: f32[32,32], index: 0, kind: input, shape index: {}]   ;;  %s411_s1 = inlined_call_operand.vmem [shape: f32[32,32], index: 1, kind: input, shape index: {}]   ;;  %s412_s2 = inlined_call_operand.vmem [shape: f32[1,32], index: 2, kind: input, shape index: {}]   ;;  %s413_s3 = inlined_call_operand.vmem [shape: f32[1,32], index: 3, kind: input, shape index: {}]   ;;  %s414_s4 = inlined_call_operand.vmem [shape: f32[32,32], index: 4, kind: output, shape index: {}]  }
   0x1 LB: > { %s328_s16 = sadd.s32 4294967295, %s357_s15   ;;  %p332_p0 = scmp.ge.s32.totalorder %s357_s15, 1  ;;  %s357_s15 = sphi %s384_s15, %s14_s15  }
   0x2   : > { %p174_p1 = scmp.lt.s32.totalorder %s357_s15, 3 }
   0x4   : > { %p175_p2 = pnand %p332_p0, %p174_p1 }
   0x5   : > { %s333_s17 = sshll.u32 (!%p175_p2), %s328_s16, 1  ;;  %v223_v0 = vld [vmem:[%s412_s2] sm:$0x1] (!%p175_p2)  ;;  %v234_v4 = vlaneseq (!%p175_p2)  ;;  %vm257_vm0 = vcmask (!%p175_p2), 261120  }
   0x6   : > { %178 = sbr.rel (%p175_p2) target bundleno = 32 (0x20), region = 36  ;;  %v225_v1 = vld [vmem:[%s413_s3] sm:$0x1] (!%p175_p2)  ;;  %p206_p3 = scmp.lt.s32.totalorder (!%p175_p2), %s333_s17, 3  ;;  %v224_v2 = vmul.f32 (!%p175_p2), 0.015625, %v223_v0 }
   0x7   : > { %v226_v3 = vmul.f32 (!%p175_p2), 0.015625, %v225_v1  ;;  %v235_v7 = vshrl.u32 (!%p175_p2), %v234_v4, 7 }
   0x8   : > { %v227_v5 = vmul.f32 (!%p175_p2), %v224_v2, %v224_v2 }
   0x9   : > { %v236_v9 = vsub.s32 (!%p175_p2), 0, %v235_v7 }
   0xa   : > { %v228_v6 = vsub.f32 (!%p175_p2), %v226_v3, %v227_v5 }
   0xb   : > { %v237_v11 = vrot.slane (!%p175_p2), %v224_v2, %v236_v9 }
   0xc   : > { %v229_v8 = vadd.f32 (!%p175_p2), 1e-05, %v228_v6 }
   0xd   : > { %s416_s17 = smov (!%p206_p3, %s333_s17), 3 }
   0xe   : > { %s334_s22 = sshll.u32 %s416_s17, 3  ;;  %349 = vrsqrt.f32 %v229_v8 }
   0xf   : > { %s209_s25 = scalar_lea.vmem %s410_s0, %s334_s22  ;;  %s215_s28 = scalar_lea.vmem %s411_s1, %s334_s22 }
  0x10   : > { %v231_v10 = vld [vmem:[%s209_s25] sm:$0xff]  ;;  %v232_v12 = vld [vmem:[%s209_s25 + $0x8] sm:$0xff]  ;;  %s221_s5 = scalar_lea.vmem %s414_s4, %s334_s22 }
  0x11   : > { %v249_v13 = vld [vmem:[%s215_s28] sm:$0xff]  ;;  %v250_v14 = vld [vmem:[%s215_s28 + $0x8] sm:$0xff]  ;;  %v239_v15 = vsub.f32 %v231_v10, %v237_v11  ;;  %v240_v16 = vsub.f32 %v232_v12, %v237_v11 }
  0x12   : > { %v251_v17 = vsub.f32 %v249_v13, %v237_v11  ;;  %v252_v18 = vsub.f32 %v250_v14, %v237_v11 }
  0x18   : > { %v350_v19 = vpop.eup %349 }
  0x19   : > { %v245_v20 = vrot.slane %v350_v19, %v236_v9 }
  0x1b   : > { %v247_v21 = vmul.f32 %v245_v20, %v239_v15  ;;  %v253_v22 = vmul.f32 %v251_v17, %v245_v20  ;;  %v248_v23 = vmul.f32 %v245_v20, %v240_v16  ;;  %v254_v24 = vmul.f32 %v252_v18, %v245_v20 }
  0x1d   : > { %v255_v25 = vmax.f32 %v247_v21, %v253_v22  ;;  %v256_v26 = vmax.f32 %v248_v23, %v254_v24 }
  0x1f   : > { %258 = vst.msk [vmem:[%s221_s5] sm:$0xff] %vm257_vm0, %v255_v25  ;;  %259 = vst.msk [vmem:[%s221_s5 + $0x8] sm:$0xff] %vm257_vm0, %v256_v26 }
  0x20 PF: > { %s14_s15 = sadd.s32 1, %s357_s15  }
  0x21   : > { %p11_p4 = scmp.ge.s32.totalorder %s14_s15, 4  }
  0x23   :  { %13 = sbr.rel (!%p11_p4) target bundleno = 1 (0x1), region = 69 }

// kernel: vibration_encoder_forward.7
= control target key start
LH: loop header
LB: loop body
LE: loop exit
PB: predicated region body
PF: predicated region fallthrough
CT: control target
= control target key end

     0   :  { %s819_s18 = smov 0   ;;  %s1085_s0 = inlined_call_operand.vmem [shape: f32[64,512], index: 0, kind: input, shape index: {}]   ;;  %s1086_s1 = inlined_call_operand.vmem [shape: f32[512,32], index: 1, kind: input, shape index: {}]   ;;  %s1087_s2 = inlined_call_operand.vmem [shape: f32[1,32], index: 2, kind: input, shape index: {}]   ;;  %s1088_s3 = inlined_call_operand.vmem [shape: f32[64,32], index: 3, kind: output, shape index: {0}]   ;;  %s1089_s4 = inlined_call_operand.vmem [shape: f32[1,32], index: 4, kind: output, shape index: {1}]   ;;  %s1090_s5 = inlined_call_operand.vmem [shape: f32[1,32], index: 5, kind: output, shape index: {2}]  }
   0x1 LB: > { %s604_s19 = sadd.s32 4294967295, %s786_s18   ;;  %p608_p0 = scmp.ge.s32.totalorder %s786_s18, 1  ;;  %s786_s18 = sphi %s819_s18, %s16_s18  }
   0x2   : > { %p184_p1 = scmp.lt.s32.totalorder %s786_s18, 3 }
   0x4   : > { %p185_p2 = pnand %p608_p0, %p184_p1 }
   0x5   : > { %s609_s20 = sshll.u32 (!%p185_p2), %s604_s19, 2  ;;  %p614_p4 = scmp.ne.s32.totalorder (!%p185_p2), %s604_s19, 0 }
   0x6   : > { %188 = sbr.rel (%p185_p2) target bundleno = 308 (0x134), region = 32  ;;  %p214_p3 = scmp.lt.s32.totalorder (!%p185_p2), %s609_s20, 7 }
   0xd   : > { %s1092_s20 = smov (!%p214_p3, %s609_s20), 7  ;;  %229 = sbr.rel (%p614_p4) target bundleno = 20 (0x14), region = 36 }
   0xe   : > { %s618_s21 = sshll.u32 %s1092_s20, 5  ;;  %s613_s22 = sshll.u32 %s1092_s20, 3  ;;  %vm230_vm0 = vcmask (!%p614_p4), 253952   ;;  %v788_v0 = vmov (!%p614_p4), 0.0  }
   0xf   : > { %s830_s25 = scalar_lea.vmem %s1085_s0, %s618_s21  ;;  %s835_s28 = scalar_lea.vmem %s1088_s3, %s613_s22  ;;  %231 = vst.msk [vmem:[%s1089_s4] sm:$0x1] (!%p614_p4), %vm230_vm0, %v788_v0  ;;  %232 = vst.msk [vmem:[%s1090_s5] sm:$0x1] (!%p614_p4), %vm230_vm0, %v788_v0 }
  0x14 PF: > { %v265_v1 = vld [vmem:[%s1086_s1 + $0x80] sm:$0xff]  ;;  %v266_v2 = vld [vmem:[%s1086_s1 + $0x88] sm:$0xff]  ;;  %v267_v12 = vld [vmem:[%s1086_s1 + $0x90] sm:$0xff]  ;;  %vm494_vm1 = vcmask 261120   ;;  %vm514_vm2 = vcmask 253952  }
  0x15   : > { %v249_v3 = vld [vmem:[%s1086_s1] sm:$0xff]  ;;  %v707_v4 = vpack.c.bf16 %v266_v2, %v265_v1  ;;  %v250_v5 = vld [vmem:[%s1086_s1 + $0x8] sm:$0xff]  ;;  %v268_v14 = vld [vmem:[%s1086_s1 + $0x98] sm:$0xff] }
  0x16   : > { %v297_v6 = vld [vmem:[%s1086_s1 + $0x180] sm:$0xff]  ;;  %v298_v7 = vld [vmem:[%s1086_s1 + $0x188] sm:$0xff]  ;;  %v709_v8 = vpack.c.bf16 %v250_v5, %v249_v3  ;;  %v251_v15 = vld [vmem:[%s1086_s1 + $0x10] sm:$0xff]  ;;  %v711_v17 = vpack.c.bf16 %v268_v14, %v267_v12 }
  0x17   : > { %v739_v9 = vpack.c.bf16 %v298_v7, %v297_v6  ;;  %v281_v10 = vld [vmem:[%s1086_s1 + $0x100] sm:$0xff]  ;;  %v282_v11 = vld [vmem:[%s1086_s1 + $0x108] sm:$0xff]  ;;  %708 = vmatprep.subr.bf16.mxu0 %v707_v4  ;;  %v252_v16 = vld [vmem:[%s1086_s1 + $0x18] sm:$0xff] }
  0x18   : > { %v741_v13 = vpack.c.bf16 %v282_v11, %v281_v10  ;;  %710 = vmatpush3.bf16.msra.mxu0 %v709_v8  ;;  %v713_v18 = vpack.c.bf16 %v252_v16, %v251_v15  ;;  %v299_v19 = vld [vmem:[%s1086_s1 + $0x190] sm:$0xff]  ;;  %v300_v20 = vld [vmem:[%s1086_s1 + $0x198] sm:$0xff]  ;;  %v269_v24 = vld [vmem:[%s1086_s1 + $0xa0] sm:$0xff] }
  0x19   : > { %740 = vmatprep.subr.bf16.mxu1 %v739_v9  ;;  %v283_v21 = vld [vmem:[%s1086_s1 + $0x110] sm:$0xff]  ;;  %v743_v22 = vpack.c.bf16 %v300_v20, %v299_v19  ;;  %v284_v23 = vld [vmem:[%s1086_s1 + $0x118] sm:$0xff]  ;;  %v270_v25 = vld [vmem:[%s1086_s1 + $0xa8] sm:$0xff]  ;;  %712 = vmatprep.subr.bf16.mxu0 %v711_v17 }
  0x1a   : > { %742 = vmatpush3.bf16.msra.mxu1 %v741_v13  ;;  %v745_v26 = vpack.c.bf16 %v284_v23, %v283_v21  ;;  %v715_v27 = vpack.c.bf16 %v270_v25, %v269_v24  ;;  %v253_v28 = vld [vmem:[%s1086_s1 + $0x20] sm:$0xff]  ;;  %v254_v29 = vld [vmem:[%s1086_s1 + $0x28] sm:$0xff]  ;;  %v271_v36 = vld [vmem:[%s1086_s1 + $0xb0] sm:$0xff] }
  0x1b   : > { %v301_v30 = vld [vmem:[%s1086_s1 + $0x1a0] sm:$0xff]  ;;  %744 = vmatprep.subr.bf16.mxu1 %v743_v22  ;;  %v302_v31 = vld [vmem:[%s1086_s1 + $0x1a8] sm:$0xff]  ;;  %v717_v34 = vpack.c.bf16 %v254_v29, %v253_v28  ;;  %v272_v37 = vld [vmem:[%s1086_s1 + $0xb8] sm:$0xff] }
  0x1c   : > { %v285_v32 = vld [vmem:[%s1086_s1 + $0x120] sm:$0xff]  ;;  %v286_v33 = vld [vmem:[%s1086_s1 + $0x128] sm:$0xff]  ;;  %714 = vmatpush3.bf16.msra.mxu0 %v713_v18  ;;  %v747_v35 = vpack.c.bf16 %v302_v31, %v301_v30  ;;  %v255_v38 = vld [vmem:[%s1086_s1 + $0x30] sm:$0xff]  ;;  %v719_v40 = vpack.c.bf16 %v272_v37, %v271_v36 }
  0x1d   : > { %716 = vmatprep.subr.bf16.mxu0 %v715_v27  ;;  %v749_v39 = vpack.c.bf16 %v286_v33, %v285_v32  ;;  %v256_v41 = vld [vmem:[%s1086_s1 + $0x38] sm:$0xff]  ;;  %v303_v42 = vld [vmem:[%s1086_s1 + $0x1b0] sm:$0xff]  ;;  %v273_v47 = vld [vmem:[%s1086_s1 + $0xc0] sm:$0xff] }
  0x1e   : > { %746 = vmatpush3.bf16.msra.mxu1 %v745_v26  ;;  %v304_v43 = vld [vmem:[%s1086_s1 + $0x1b8] sm:$0xff]  ;;  %v287_v45 = vld [vmem:[%s1086_s1 + $0x130] sm:$0xff]  ;;  %v274_v48 = vld [vmem:[%s1086_s1 + $0xc8] sm:$0xff]  ;;  %v721_v49 = vpack.c.bf16 %v256_v41, %v255_v38 }
  0x1f   : > { %748 = vmatprep.subr.bf16.mxu1 %v747_v35  ;;  %v751_v44 = vpack.c.bf16 %v304_v43, %v303_v42  ;;  %v288_v46 = vld [vmem:[%s1086_s1 + $0x138] sm:$0xff]  ;;  %v305_v50 = vld [vmem:[%s1086_s1 + $0x1c0] sm:$0xff]  ;;  %v306_v51 = vld [vmem:[%s1086_s1 + $0x1c8] sm:$0xff]  ;;  %v723_v53 = vpack.c.bf16 %v274_v48, %v273_v47 }
  0x20   : > { %718 = vmatpush3.bf16.msra.mxu0 %v717_v34  ;;  %v753_v52 = vpack.c.bf16 %v288_v46, %v287_v45  ;;  %v257_v54 = vld [vmem:[%s1086_s1 + $0x40] sm:$0xff]  ;;  %v258_v55 = vld [vmem:[%s1086_s1 + $0x48] sm:$0xff]  ;;  %v755_v57 = vpack.c.bf16 %v306_v51, %v305_v50  ;;  %v275_v59 = vld [vmem:[%s1086_s1 + $0xd0] sm:$0xff] }
  0x21   : > { %720 = vmatprep.subr.bf16.mxu0 %v719_v40  ;;  %v289_v56 = vld [vmem:[%s1086_s1 + $0x140] sm:$0xff]  ;;  %v290_v58 = vld [vmem:[%s1086_s1 + $0x148] sm:$0xff]  ;;  %v276_v60 = vld [vmem:[%s1086_s1 + $0xd8] sm:$0xff]  ;;  %v725_v63 = vpack.c.bf16 %v258_v55, %v257_v54 }
  0x22   : > { %750 = vmatpush3.bf16.msra.mxu1 %v749_v39  ;;  %v307_v61 = vld [vmem:[%s1086_s1 + $0x1d0] sm:$0xff]  ;;  %v308_v62 = vld [vmem:[%s1086_s1 + $0x1d8] sm:$0xff]  ;;  %v757_v0 = vpack.c.bf16 %v290_v58, %v289_v56  ;;  %v727_v1 = vpack.c.bf16 %v276_v60, %v275_v59  ;;  %v277_v7 = vld [vmem:[%s1086_s1 + $0xe0] sm:$0xff] }
  0x23   : > { %752 = vmatprep.subr.bf16.mxu1 %v751_v44  ;;  %v259_v2 = vld [vmem:[%s1086_s1 + $0x50] sm:$0xff]  ;;  %v260_v3 = vld [vmem:[%s1086_s1 + $0x58] sm:$0xff]  ;;  %v759_v5 = vpack.c.bf16 %v308_v62, %v307_v61  ;;  %v278_v8 = vld [vmem:[%s1086_s1 + $0xe8] sm:$0xff] }
  0x24   : > { %722 = vmatpush3.bf16.msra.mxu0 %v721_v49  ;;  %v291_v4 = vld [vmem:[%s1086_s1 + $0x150] sm:$0xff]  ;;  %v292_v6 = vld [vmem:[%s1086_s1 + $0x158] sm:$0xff]  ;;  %v309_v9 = vld [vmem:[%s1086_s1 + $0x1e0] sm:$0xff]  ;;  %v729_v11 = vpack.c.bf16 %v260_v3, %v259_v2  ;;  %v731_v15 = vpack.c.bf16 %v278_v8, %v277_v7 }
  0x25   : > { %724 = vmatprep.subr.bf16.mxu0 %v723_v53  ;;  %v310_v10 = vld [vmem:[%s1086_s1 + $0x1e8] sm:$0xff]  ;;  %v261_v12 = vld [vmem:[%s1086_s1 + $0x60] sm:$0xff]  ;;  %v761_v14 = vpack.c.bf16 %v292_v6, %v291_v4  ;;  %v279_v20 = vld [vmem:[%s1086_s1 + $0xf0] sm:$0xff] }
  0x26   : > { %754 = vmatpush3.bf16.msra.mxu1 %v753_v52  ;;  %v262_v13 = vld [vmem:[%s1086_s1 + $0x68] sm:$0xff]  ;;  %v293_v16 = vld [vmem:[%s1086_s1 + $0x160] sm:$0xff]  ;;  %v763_v19 = vpack.c.bf16 %v310_v10, %v309_v9  ;;  %v280_v21 = vld [vmem:[%s1086_s1 + $0xf8] sm:$0xff] }
  0x27   : > { %756 = vmatprep.subr.bf16.mxu1 %v755_v57  ;;  %v294_v17 = vld [vmem:[%s1086_s1 + $0x168] sm:$0xff]  ;;  %v236_v22 = vld [vmem:[%s830_s25 + $0x18] sm:$0xff]  ;;  %v311_v23 = vld [vmem:[%s1086_s1 + $0x1f0] sm:$0xff]  ;;  %v733_v25 = vpack.c.bf16 %v262_v13, %v261_v12  ;;  %v735_v27 = vpack.c.bf16 %v280_v21, %v279_v20 }
  0x28   : > { %726 = vmatpush3.bf16.msra.mxu0 %v725_v63  ;;  %v234_v18 = vld [vmem:[%s830_s25 + $0x8] sm:$0xff]  ;;  %v312_v24 = vld [vmem:[%s1086_s1 + $0x1f8] sm:$0xff]  ;;  %469 = vmatprep.mubr.f32.mxu1 %v236_v22  ;;  %v765_v26 = vpack.c.bf16 %v294_v17, %v293_v16  ;;  %v263_v28 = vld [vmem:[%s1086_s1 + $0x70] sm:$0xff] }
  0x29   : > { %728 = vmatprep.subr.bf16.mxu0 %v727_v1  ;;  %384 = vmatprep.mubr.f32.mxu0 %v234_v18  ;;  %v264_v29 = vld [vmem:[%s1086_s1 + $0x78] sm:$0xff]  ;;  %v767_v30 = vpack.c.bf16 %v312_v24, %v311_v23  ;;  %v295_v31 = vld [vmem:[%s1086_s1 + $0x170] sm:$0xff]  ;;  %v233_v35 = vld [vmem:[%s830_s25] sm:$0xff] }
  0x2a   : > { %758 = vmatpush3.bf16.msra.mxu1 %v757_v0  ;;  %v296_v32 = vld [vmem:[%s1086_s1 + $0x178] sm:$0xff]  ;;  %v737_v33 = vpack.c.bf16 %v264_v29, %v263_v28  ;;  %v235_v36 = vld [vmem:[%s830_s25 + $0x10] sm:$0xff]  ;;  %v238_v37 = vld [vmem:[%s830_s25 + $0x28] sm:$0xff] }
  0x2b   : > { %760 = vmatprep.subr.bf16.mxu1 %v759_v5  ;;  %v769_v34 = vpack.c.bf16 %v296_v32, %v295_v31  ;;  %v240_v38 = vld [vmem:[%s830_s25 + $0x38] sm:$0xff]  ;;  %v237_v39 = vld [vmem:[%s830_s25 + $0x20] sm:$0xff]  ;;  %v239_v40 = vld [vmem:[%s830_s25 + $0x30] sm:$0xff] }
  0x2c   : > { %730 = vmatpush3.bf16.msra.mxu0 %v729_v11  ;;  %v242_v41 = vld [vmem:[%s830_s25 + $0x48] sm:$0xff]  ;;  %v244_v42 = vld [vmem:[%s830_s25 + $0x58] sm:$0xff]  ;;  %v241_v43 = vld [vmem:[%s830_s25 + $0x40] sm:$0xff] }
  0x2d   : > { %732 = vmatprep.subr.bf16.mxu0 %v731_v15  ;;  %v243_v44 = vld [vmem:[%s830_s25 + $0x50] sm:$0xff]  ;;  %v246_v45 = vld [vmem:[%s830_s25 + $0x68] sm:$0xff]  ;;  %v248_v46 = vld [vmem:[%s830_s25 + $0x78] sm:$0xff] }
  0x2e   : > { %762 = vmatpush3.bf16.msra.mxu1 %v761_v14  ;;  %v245_v47 = vld [vmem:[%s830_s25 + $0x60] sm:$0xff]  ;;  %v247_v48 = vld [vmem:[%s830_s25 + $0x70] sm:$0xff] }
  0x2f   : > { %764 = vmatprep.subr.bf16.mxu1 %v763_v19  ;;  %v615_v50 = vld [vmem:[%s1087_s2] ss:$0 sm:$0xff] }
  0x30   : > { %734 = vmatpush3.bf16.msra.mxu0 %v733_v25 }
  0x31   : > { %736 = vmatprep.subr.bf16.mxu0 %v735_v27 }
  0x32   : > { %766 = vmatpush3.bf16.msra.mxu1 %v765_v26 }
  0x33   : > { %768 = vmatprep.subr.bf16.mxu1 %v767_v30 }
  0x34   : > { %738 = vmatpush3.bf16.msra.mxu0 %v737_v33 }
  0x36   : > { %770 = vmatpush3.bf16.msra.mxu1 %v769_v34 }
  0x37   : > { %385 = vmatmul.mubr.f32.vlgmr.msra.gmra.mrb[0].mxu0 %v233_v35 }
  0x38   : > { %389 = vmatprep.mubr.f32.mxu0 %v238_v37 }
  0x39   : > { %470 = vmatmul.mubr.f32.vlgmr.msra.gmra.mrb[0].mxu1 %v235_v36 }
  0x3a   : > { %474 = vmatprep.mubr.f32.mxu1 %v240_v38 }
  0x3b   : > { %390 = vmatmul.mubr.f32.gmra.mrb[2].mxu0 %v237_v39 }
  0x3c   : > { %394 = vmatprep.mubr.f32.mxu0 %v242_v41 }
  0x3d   : > { %475 = vmatmul.mubr.f32.gmra.mrb[2].mxu1 %v239_v40 }
  0x3e   : > { %479 = vmatprep.mubr.f32.mxu1 %v244_v42 }
  0x3f   : > { %395 = vmatmul.mubr.f32.gmra.mrb[4].mxu0 %v241_v43 }
  0x40   : > { %399 = vmatprep.mubr.f32.mxu0 %v246_v45 }
  0x41   : > { %480 = vmatmul.mubr.f32.gmra.mrb[4].mxu1 %v243_v44 }
  0x42   : > { %484 = vmatprep.mubr.f32.mxu1 %v248_v46 }
  0x43   : > { %400 = vmatmul.mubr.f32.gmra.mrb[6].mxu0 %v245_v47 }
  0x45   : > { %485 = vmatmul.mubr.f32.gmra.mrb[6].mxu1 %v247_v48 }
 0x10a   : > { %v651_v49 = vpop.f32.mrb[0].mxu0 }
 0x10b   : > { %v652_v51 = vpop.f32.mrb[1].mxu0 }
 0x10c   : > { %v695_v52 = vpop.f32.mrb[0].mxu1  ;;  %v653_v53 = vadd.f32 %v652_v51, %v651_v49  ;;  %v499_v49 = vld [vmem:[%s1089_s4] sm:$0x1] }
 0x10d   : > { %v696_v54 = vpop.f32.mrb[1].mxu1 }
 0x10e   : > { %v697_v55 = vadd.f32 %v696_v54, %v695_v52  ;;  %v387_v56 = vadd.f32 %v653_v53, %v615_v50  ;;  %v654_v57 = vpop.f32.mrb[2].mxu0  ;;  %v516_v52 = vld [vmem:[%s1090_s5] sm:$0x1] }
 0x10f   : > { %v655_v58 = vpop.f32.mrb[3].mxu0 }
 0x110   : > { %v698_v59 = vpop.f32.mrb[2].mxu1  ;;  %v472_v60 = vadd.f32 %v697_v55, %v387_v56  ;;  %v656_v61 = vadd.f32 %v655_v58, %v654_v57 }
 0x111   : > { %v699_v62 = vpop.f32.mrb[3].mxu1 }
 0x112   : > { %v700_v63 = vadd.f32 %v699_v62, %v698_v59  ;;  %v490_v0 = vmax.f32 %v472_v60, 0.0  ;;  %v392_v1 = vadd.f32 %v656_v61, %v615_v50  ;;  %v657_v2 = vpop.f32.mrb[4].mxu0 }
 0x113   : > { %v658_v3 = vpop.f32.mrb[5].mxu0 }
 0x114   : > { %v701_v4 = vpop.f32.mrb[4].mxu1  ;;  %495 = vst.msk [vmem:[%s835_s28] sm:$0xff] %vm494_vm1, %v490_v0  ;;  %v477_v5 = vadd.f32 %v700_v63, %v392_v1  ;;  %v659_v6 = vadd.f32 %v658_v3, %v657_v2  ;;  %v517_v9 = vmul.f32 %v490_v0, %v490_v0  ;;  %v500_v13 = vsel %vm494_vm1, %v490_v0, 0.0 }
 0x115   : > { %v702_v7 = vpop.f32.mrb[5].mxu1 }
 0x116   : > { %v703_v8 = vadd.f32 %v702_v7, %v701_v4  ;;  %v491_v10 = vmax.f32 %v477_v5, 0.0  ;;  %v397_v11 = vadd.f32 %v659_v6, %v615_v50  ;;  %v660_v12 = vpop.f32.mrb[6].mxu0  ;;  %v521_v23 = vsel %vm494_vm1, %v517_v9, 0.0 }
 0x117   : > { %v661_v14 = vpop.f32.mrb[7].mxu0 }
 0x118   : > { %v704_v15 = vpop.f32.mrb[6].mxu1  ;;  %496 = vst.msk [vmem:[%s835_s28 + $0x8] sm:$0xff] %vm494_vm1, %v491_v10  ;;  %v501_v16 = vsel %vm494_vm1, %v491_v10, 0.0  ;;  %v518_v17 = vmul.f32 %v491_v10, %v491_v10  ;;  %v482_v18 = vadd.f32 %v703_v8, %v397_v11  ;;  %v662_v19 = vadd.f32 %v661_v14, %v660_v12 }
 0x119   : > { %v705_v20 = vpop.f32.mrb[7].mxu1  ;;  %v502_v21 = vadd.f32 %v501_v16, %v500_v13 }
 0x11a   : > { %v706_v22 = vadd.f32 %v705_v20, %v704_v15  ;;  %v522_v24 = vsel %vm494_vm1, %v518_v17, 0.0  ;;  %v492_v25 = vmax.f32 %v482_v18, 0.0  ;;  %v402_v26 = vadd.f32 %v662_v19, %v615_v50 }
 0x11b   : > { %v523_v27 = vadd.f32 %v522_v24, %v521_v23 }
 0x11c   : > { %497 = vst.msk [vmem:[%s835_s28 + $0x10] sm:$0xff] %vm494_vm1, %v492_v25  ;;  %v503_v28 = vsel %vm494_vm1, %v492_v25, 0.0  ;;  %v519_v29 = vmul.f32 %v492_v25, %v492_v25  ;;  %v487_v30 = vadd.f32 %v706_v22, %v402_v26 }
 0x11d   : > { %v504_v31 = vadd.f32 %v503_v28, %v502_v21 }
 0x11e   : > { %v524_v32 = vsel %vm494_vm1, %v519_v29, 0.0  ;;  %v493_v33 = vmax.f32 %v487_v30, 0.0 }
 0x11f   : > { %v525_v34 = vadd.f32 %v524_v32, %v523_v27 }
 0x120   : > { %498 = vst.msk [vmem:[%s835_s28 + $0x18] sm:$0xff] %vm494_vm1, %v493_v33  ;;  %v505_v35 = vsel %vm494_vm1, %v493_v33, 0.0  ;;  %v520_v36 = vmul.f32 %v493_v33, %v493_v33 }
 0x121   : > { %v506_v37 = vadd.f32 %v505_v35, %v504_v31 }
 0x122   : > { %v526_v38 = vsel %vm494_vm1, %v520_v36, 0.0 }
 0x123   : > { %v507_v39 = vrot.slane %v506_v37, 4  ;;  %v527_v40 = vadd.f32 %v526_v38, %v525_v34 }
 0x125   : > { %v508_v41 = vadd.f32 %v507_v39, %v506_v37  ;;  %v528_v42 = vrot.slane %v527_v40, 4 }
 0x127   : > { %v509_v43 = vrot.slane %v508_v41, 2  ;;  %v529_v44 = vadd.f32 %v528_v42, %v527_v40 }
 0x129   : > { %v510_v45 = vadd.f32 %v509_v43, %v508_v41  ;;  %v530_v46 = vrot.slane %v529_v44, 2 }
 0x12b   : > { %v511_v47 = vrot.slane %v510_v45, 1  ;;  %v531_v48 = vadd.f32 %v530_v46, %v529_v44 }
 0x12d   : > { %v512_v50 = vadd.f32 %v511_v47, %v510_v45  ;;  %v532_v51 = vrot.slane %v531_v48, 1 }
 0x12f   : > { %v513_v53 = vadd.f32 %v512_v50, %v499_v49  ;;  %v533_v54 = vadd.f32 %v532_v51, %v531_v48 }
 0x131   : > { %515 = vst.msk [vmem:[%s1089_s4] sm:$0x1] %vm514_vm2, %v513_v53  ;;  %v534_v55 = vadd.f32 %v533_v54, %v516_v52 }
 0x133   : > { %535 = vst.msk [vmem:[%s1090_s5] sm:$0x1] %vm514_vm2, %v534_v55 }
 0x134 PF: > { %s16_s18 = sadd.s32 1, %s786_s18  }
 0x135   : > { %p13_p5 = scmp.ge.s32.totalorder %s16_s18, 4  }
 0x137   :  { %15 = sbr.rel (!%p13_p5) target bundleno = 1 (0x1), region = 82 }

// kernel: vibration_encoder_forward.9
= control target key start
LH: loop header
LB: loop body
LE: loop exit
PB: predicated region body
PF: predicated region fallthrough
CT: control target
= control target key end

     0   :  { %s997_s0 = inlined_call_operand.vmem [shape: f32[16,512], index: 0, kind: input, shape index: {}]   ;;  %s998_s1 = inlined_call_operand.vmem [shape: f32[512,64], index: 1, kind: input, shape index: {}]   ;;  %s999_s2 = inlined_call_operand.vmem [shape: f32[1,64], index: 2, kind: input, shape index: {}]   ;;  %s1000_s3 = inlined_call_operand.vmem [shape: f32[2,16], index: 3, kind: input, shape index: {}]   ;;  %s1001_s4 = inlined_call_operand.vmem [shape: f32[64,128], index: 4, kind: input, shape index: {}]   ;;  %s1002_s5 = inlined_call_operand.vmem [shape: f32[1,128], index: 5, kind: input, shape index: {}]   ;;  %s1003_s6 = inlined_call_operand.hbm [shape: f32[2,128], index: 6, kind: output, shape index: {}]  }
   0x1   :  { %v48_v0 = vld [vmem:[%s998_s1 + $0x80] sm:$0xff]  ;;  %v49_v1 = vld [vmem:[%s998_s1 + $0x88] sm:$0xff]  ;;  %v50_v11 = vld [vmem:[%s998_s1 + $0x90] sm:$0xff] }
   0x2   :  { %v32_v2 = vld [vmem:[%s998_s1] sm:$0xff]  ;;  %v583_v3 = vpack.c.bf16 %v49_v1, %v48_v0  ;;  %v33_v4 = vld [vmem:[%s998_s1 + $0x8] sm:$0xff]  ;;  %v51_v13 = vld [vmem:[%s998_s1 + $0x98] sm:$0xff] }
   0x3   :  { %v80_v5 = vld [vmem:[%s998_s1 + $0x180] sm:$0xff]  ;;  %v81_v6 = vld [vmem:[%s998_s1 + $0x188] sm:$0xff]  ;;  %v585_v7 = vpack.c.bf16 %v33_v4, %v32_v2  ;;  %v34_v14 = vld [vmem:[%s998_s1 + $0x10] sm:$0xff]  ;;  %v587_v16 = vpack.c.bf16 %v51_v13, %v50_v11 }
   0x4   :  { %v615_v8 = vpack.c.bf16 %v81_v6, %v80_v5  ;;  %v64_v9 = vld [vmem:[%s998_s1 + $0x100] sm:$0xff]  ;;  %v65_v10 = vld [vmem:[%s998_s1 + $0x108] sm:$0xff]  ;;  %584 = vmatprep.subr.bf16.mxu0 %v583_v3  ;;  %v35_v15 = vld [vmem:[%s998_s1 + $0x18] sm:$0xff] }
   0x5   :  { %v617_v12 = vpack.c.bf16 %v65_v10, %v64_v9  ;;  %586 = vmatpush3.bf16.msra.mxu0 %v585_v7  ;;  %v589_v17 = vpack.c.bf16 %v35_v15, %v34_v14  ;;  %v82_v18 = vld [vmem:[%s998_s1 + $0x190] sm:$0xff]  ;;  %v83_v19 = vld [vmem:[%s998_s1 + $0x198] sm:$0xff]  ;;  %v52_v23 = vld [vmem:[%s998_s1 + $0xa0] sm:$0xff] }
   0x6   :  { %616 = vmatprep.subr.bf16.mxu1 %v615_v8  ;;  %v66_v20 = vld [vmem:[%s998_s1 + $0x110] sm:$0xff]  ;;  %v619_v21 = vpack.c.bf16 %v83_v19, %v82_v18  ;;  %v67_v22 = vld [vmem:[%s998_s1 + $0x118] sm:$0xff]  ;;  %v53_v24 = vld [vmem:[%s998_s1 + $0xa8] sm:$0xff]  ;;  %588 = vmatprep.subr.bf16.mxu0 %v587_v16 }
   0x7   :  { %618 = vmatpush3.bf16.msra.mxu1 %v617_v12  ;;  %v621_v25 = vpack.c.bf16 %v67_v22, %v66_v20  ;;  %v591_v26 = vpack.c.bf16 %v53_v24, %v52_v23  ;;  %v36_v27 = vld [vmem:[%s998_s1 + $0x20] sm:$0xff]  ;;  %v37_v28 = vld [vmem:[%s998_s1 + $0x28] sm:$0xff]  ;;  %v54_v35 = vld [vmem:[%s998_s1 + $0xb0] sm:$0xff] }
   0x8   :  { %v84_v29 = vld [vmem:[%s998_s1 + $0x1a0] sm:$0xff]  ;;  %620 = vmatprep.subr.bf16.mxu1 %v619_v21  ;;  %v85_v30 = vld [vmem:[%s998_s1 + $0x1a8] sm:$0xff]  ;;  %v593_v33 = vpack.c.bf16 %v37_v28, %v36_v27  ;;  %v55_v36 = vld [vmem:[%s998_s1 + $0xb8] sm:$0xff] }
   0x9   :  { %v68_v31 = vld [vmem:[%s998_s1 + $0x120] sm:$0xff]  ;;  %v69_v32 = vld [vmem:[%s998_s1 + $0x128] sm:$0xff]  ;;  %590 = vmatpush3.bf16.msra.mxu0 %v589_v17  ;;  %v623_v34 = vpack.c.bf16 %v85_v30, %v84_v29  ;;  %v38_v37 = vld [vmem:[%s998_s1 + $0x30] sm:$0xff]  ;;  %v595_v39 = vpack.c.bf16 %v55_v36, %v54_v35 }
   0xa   :  { %592 = vmatprep.subr.bf16.mxu0 %v591_v26  ;;  %v625_v38 = vpack.c.bf16 %v69_v32, %v68_v31  ;;  %v39_v40 = vld [vmem:[%s998_s1 + $0x38] sm:$0xff]  ;;  %v86_v41 = vld [vmem:[%s998_s1 + $0x1b0] sm:$0xff]  ;;  %v56_v46 = vld [vmem:[%s998_s1 + $0xc0] sm:$0xff] }
   0xb   :  { %622 = vmatpush3.bf16.msra.mxu1 %v621_v25  ;;  %v87_v42 = vld [vmem:[%s998_s1 + $0x1b8] sm:$0xff]  ;;  %v70_v44 = vld [vmem:[%s998_s1 + $0x130] sm:$0xff]  ;;  %v57_v47 = vld [vmem:[%s998_s1 + $0xc8] sm:$0xff]  ;;  %v597_v48 = vpack.c.bf16 %v39_v40, %v38_v37 }
   0xc   :  { %624 = vmatprep.subr.bf16.mxu1 %v623_v34  ;;  %v627_v43 = vpack.c.bf16 %v87_v42, %v86_v41  ;;  %v71_v45 = vld [vmem:[%s998_s1 + $0x138] sm:$0xff]  ;;  %v88_v49 = vld [vmem:[%s998_s1 + $0x1c0] sm:$0xff]  ;;  %v89_v50 = vld [vmem:[%s998_s1 + $0x1c8] sm:$0xff]  ;;  %v599_v52 = vpack.c.bf16 %v57_v47, %v56_v46 }
   0xd   :  { %594 = vmatpush3.bf16.msra.mxu0 %v593_v33  ;;  %v629_v51 = vpack.c.bf16 %v71_v45, %v70_v44  ;;  %v40_v53 = vld [vmem:[%s998_s1 + $0x40] sm:$0xff]  ;;  %v41_v54 = vld [vmem:[%s998_s1 + $0x48] sm:$0xff]  ;;  %v631_v56 = vpack.c.bf16 %v89_v50, %v88_v49  ;;  %v58_v58 = vld [vmem:[%s998_s1 + $0xd0] sm:$0xff] }
   0xe   :  { %596 = vmatprep.subr.bf16.mxu0 %v595_v39  ;;  %v72_v55 = vld [vmem:[%s998_s1 + $0x140] sm:$0xff]  ;;  %v73_v57 = vld [vmem:[%s998_s1 + $0x148] sm:$0xff]  ;;  %v59_v59 = vld [vmem:[%s998_s1 + $0xd8] sm:$0xff]  ;;  %v601_v62 = vpack.c.bf16 %v41_v54, %v40_v53 }
   0xf   :  { %626 = vmatpush3.bf16.msra.mxu1 %v625_v38  ;;  %v90_v60 = vld [vmem:[%s998_s1 + $0x1d0] sm:$0xff]  ;;  %v91_v61 = vld [vmem:[%s998_s1 + $0x1d8] sm:$0xff]  ;;  %v633_v63 = vpack.c.bf16 %v73_v57, %v72_v55  ;;  %v603_v0 = vpack.c.bf16 %v59_v59, %v58_v58  ;;  %v60_v6 = vld [vmem:[%s998_s1 + $0xe0] sm:$0xff] }
  0x10   :  { %628 = vmatprep.subr.bf16.mxu1 %v627_v43  ;;  %v42_v1 = vld [vmem:[%s998_s1 + $0x50] sm:$0xff]  ;;  %v43_v2 = vld [vmem:[%s998_s1 + $0x58] sm:$0xff]  ;;  %v635_v4 = vpack.c.bf16 %v91_v61, %v90_v60  ;;  %v61_v7 = vld [vmem:[%s998_s1 + $0xe8] sm:$0xff] }
  0x11   :  { %598 = vmatpush3.bf16.msra.mxu0 %v597_v48  ;;  %v74_v3 = vld [vmem:[%s998_s1 + $0x150] sm:$0xff]  ;;  %v75_v5 = vld [vmem:[%s998_s1 + $0x158] sm:$0xff]  ;;  %v92_v8 = vld [vmem:[%s998_s1 + $0x1e0] sm:$0xff]  ;;  %v605_v10 = vpack.c.bf16 %v43_v2, %v42_v1  ;;  %v607_v14 = vpack.c.bf16 %v61_v7, %v60_v6 }
  0x12   :  { %600 = vmatprep.subr.bf16.mxu0 %v599_v52  ;;  %v93_v9 = vld [vmem:[%s998_s1 + $0x1e8] sm:$0xff]  ;;  %v44_v11 = vld [vmem:[%s998_s1 + $0x60] sm:$0xff]  ;;  %v637_v13 = vpack.c.bf16 %v75_v5, %v74_v3  ;;  %v62_v19 = vld [vmem:[%s998_s1 + $0xf0] sm:$0xff] }
  0x13   :  { %630 = vmatpush3.bf16.msra.mxu1 %v629_v51  ;;  %v45_v12 = vld [vmem:[%s998_s1 + $0x68] sm:$0xff]  ;;  %v76_v15 = vld [vmem:[%s998_s1 + $0x160] sm:$0xff]  ;;  %v639_v18 = vpack.c.bf16 %v93_v9, %v92_v8  ;;  %v63_v20 = vld [vmem:[%s998_s1 + $0xf8] sm:$0xff] }
  0x14   :  { %632 = vmatprep.subr.bf16.mxu1 %v631_v56  ;;  %v77_v16 = vld [vmem:[%s998_s1 + $0x168] sm:$0xff]  ;;  %v27_v21 = vld [vmem:[%s997_s0 + $0x18] sm:$0xff]  ;;  %v94_v22 = vld [vmem:[%s998_s1 + $0x1f0] sm:$0xff]  ;;  %v609_v24 = vpack.c.bf16 %v45_v12, %v44_v11 }
  0x15   :  { %602 = vmatpush3.bf16.msra.mxu0 %v601_v62  ;;  %v25_v17 = vld [vmem:[%s997_s0 + $0x8] sm:$0xff]  ;;  %v95_v23 = vld [vmem:[%s998_s1 + $0x1f8] sm:$0xff]  ;;  %242 = vmatprep.mubr.f32.mxu1 %v27_v21 }
  0x16   :  { %604 = vmatprep.subr.bf16.mxu0 %v603_v0  ;;  %167 = vmatprep.mubr.f32.mxu0 %v25_v17 }
  0x17   :  { %634 = vmatpush3.bf16.msra.mxu1 %v633_v63 }
  0x18   :  { %636 = vmatprep.subr.bf16.mxu1 %v635_v4 }
  0x19   :  { %606 = vmatpush3.bf16.msra.mxu0 %v605_v10 }
  0x1a   :  { %11 = vsyncpa [#allocation3], 0  ;;  %608 = vmatprep.subr.bf16.mxu0 %v607_v14  ;;  %v641_v25 = vpack.c.bf16 %v77_v16, %v76_v15  ;;  %v611_v26 = vpack.c.bf16 %v63_v20, %v62_v19  ;;  %v46_v27 = vld [vmem:[%s998_s1 + $0x70] sm:$0xff]  ;;  %v47_v28 = vld [vmem:[%s998_s1 + $0x78] sm:$0xff]  ;;  %v643_v29 = vpack.c.bf16 %v95_v23, %v94_v22  ;;  %v692_v40 = vmov 0.0|0.0  }
  0x1b   :  { %638 = vmatpush3.bf16.msra.mxu1 %v637_v13  ;;  %v78_v30 = vld [vmem:[%s998_s1 + $0x170] sm:$0xff]  ;;  %v79_v31 = vld [vmem:[%s998_s1 + $0x178] sm:$0xff]  ;;  %v613_v32 = vpack.c.bf16 %v47_v28, %v46_v27  ;;  %v24_v34 = vld [vmem:[%s997_s0] sm:$0xff]  ;;  %vm693_vm0 = vmmov 0   ;;  %v694_v41 = vmov 0.0   ;;  %vm255_vm1 = vcmask 523264  }
  0x1c   :  { %640 = vmatprep.subr.bf16.mxu1 %v639_v18  ;;  %v645_v33 = vpack.c.bf16 %v79_v31, %v78_v30  ;;  %v26_v35 = vld [vmem:[%s997_s0 + $0x10] sm:$0xff]  ;;  %v29_v36 = vld [vmem:[%s997_s0 + $0x28] sm:$0xff]  ;;  %v31_v37 = vld [vmem:[%s997_s0 + $0x38] sm:$0xff]  ;;  %vm288_vm2 = vcmask 130048   ;;  %s695_s1 = smov [#allocation2]  }
  0x1d   :  { %610 = vmatpush3.bf16.msra.mxu0 %v609_v24  ;;  %v28_v38 = vld [vmem:[%s997_s0 + $0x20] sm:$0xff]  ;;  %v30_v39 = vld [vmem:[%s997_s0 + $0x30] sm:$0xff]  ;;  %v363_v43 = vld [vmem:[%s1001_s4 + $0x8] sm:$0xff]  ;;  %s457_s15 = sshll.u32 %s695_s1, 4  ;;  %s458_s15 = int_to_ptr.vmem [resolvable:$true] %s457_s15 }
  0x1e   :  { %612 = vmatprep.subr.bf16.mxu0 %v611_v26  ;;  %v362_v42 = vld [vmem:[%s1001_s4] sm:$0xff]  ;;  %v364_v44 = vld [vmem:[%s1001_s4 + $0x10] sm:$0xff]  ;;  %v365_v46 = vld [vmem:[%s1001_s4 + $0x18] sm:$0xff]  ;;  %s668_s16 = scalar_lea.vmem %s458_s15, 32  ;;  %p673_p1 = scmp.lt.s32.totalorder %s458_s15, %s458_s15 }
  0x1f   :  { %642 = vmatpush3.bf16.msra.mxu1 %v641_v25  ;;  %v651_v45 = vpack.c.bf16 %v363_v43, %v362_v42  ;;  %v654_v47 = vpack.c.bf16 %v365_v46, %v364_v44  ;;  %v366_v48 = vld [vmem:[%s1001_s4 + $0x20] sm:$0xff]  ;;  %v367_v49 = vld [vmem:[%s1001_s4 + $0x28] sm:$0xff]  ;;  %v368_v51 = vld [vmem:[%s1001_s4 + $0x30] sm:$0xff]  ;;  %p669_p0 = scmp.ne.s32.totalorder %s458_s15, %s668_s16  ;;  %p674_p2 = scmp.lt.s32.totalorder %s668_s16, %s668_s16 }
  0x20   :  { %644 = vmatprep.subr.bf16.mxu1 %v643_v29  ;;  %v657_v50 = vpack.c.bf16 %v367_v49, %v366_v48  ;;  %v369_v52 = vld [vmem:[%s1001_s4 + $0x38] sm:$0xff]  ;;  %v465_v55 = vld [vmem:[%s999_s2] ss:$0 sm:$0xff] }
  0x21   :  { %614 = vmatpush3.bf16.msra.mxu0 %v613_v32  ;;  %v660_v53 = vpack.c.bf16 %v369_v52, %v368_v51  ;;  %v467_v43 = vld [vmem:[%s1002_s5] ss:$0 sm:$0xff]  ;;  %p675_p3 = por %p674_p2, %p673_p1 }
  0x22   :  { %647 = vmatprep.subr.bf16.mxu0 %v692_v40 }
  0x23   :  { %646 = vmatpush3.bf16.msra.mxu1 %v645_v33  ;;  %p676_p4 = pnand %p675_p3, %p669_p0 }
  0x24   :  { %168 = vmatmul.mubr.f32.vlgmr.msra.gmra.mrb[0].mxu0 %v24_v34  ;;  %650 = vmatprep.subr.bf16.mxu1 %v692_v40 }
  0x25   :  { %172 = vmatprep.mubr.f32.mxu0 %v29_v36 }
  0x26   :  { %243 = vmatmul.mubr.f32.vlgmr.msra.gmra.mrb[0].mxu1 %v26_v35 }
  0x27   :  { %247 = vmatprep.mubr.f32.mxu1 %v31_v37  ;;  %652 = vmatpush3.bf16.msra.mxu1 %v651_v45 }
  0x28   :  { %173 = vmatmul.mubr.f32.gmra.mrb[2].mxu0 %v28_v38  ;;  %653 = vmatprep.subr.bf16.mxu1 %v692_v40 }
  0x29   :  { %561 = vmatprep.mubr.msk.f32.mxu0 %vm693_vm0, %v694_v41 }
  0x2a   :  { %248 = vmatmul.mubr.f32.gmra.mrb[2].mxu1 %v30_v39 }
  0x2b   :  { %580 = vmatprep.mubr.msk.f32.mxu1 %vm693_vm0, %v694_v41  ;;  %655 = vmatpush3.bf16.msra.mxu1 %v654_v47 }
  0x2c   :  { %656 = vmatprep.subr.bf16.mxu1 %v692_v40 }
  0x2f   :  { %658 = vmatpush3.bf16.msra.mxu1 %v657_v50 }
  0x30   :  { %659 = vmatprep.subr.bf16.mxu1 %v692_v40  ;;  %v287_v40 = vld [vmem:[%s1000_s3] sm:$0x3] }
  0x33   :  { %661 = vmatpush3.bf16.msra.mxu1 %v660_v53 }
  0xf7   :  { %v501_v54 = vpop.f32.mrb[0].mxu0 }
  0xf8   :  { %v502_v56 = vpop.f32.mrb[1].mxu0 }
  0xf9   :  { %v539_v57 = vpop.f32.mrb[0].mxu1  ;;  %v503_v58 = vadd.f32 %v502_v56, %v501_v54 }
  0xfa   :  { %v540_v59 = vpop.f32.mrb[1].mxu1 }
  0xfb   :  { %v541_v60 = vadd.f32 %v540_v59, %v539_v57  ;;  %v170_v61 = vadd.f32 %v503_v58, %v465_v55  ;;  %v504_v62 = vpop.f32.mrb[2].mxu0 }
  0xfc   :  { %v505_v63 = vpop.f32.mrb[3].mxu0 }
  0xfd   :  { %v542_v0 = vpop.f32.mrb[2].mxu1  ;;  %v245_v1 = vadd.f32 %v541_v60, %v170_v61  ;;  %v506_v2 = vadd.f32 %v505_v63, %v504_v62 }
  0xfe   :  { %v543_v3 = vpop.f32.mrb[3].mxu1 }
  0xff   :  { %v544_v4 = vadd.f32 %v543_v3, %v542_v0  ;;  %v253_v5 = vmax.f32 %v245_v1, 0.0  ;;  %v175_v6 = vadd.f32 %v506_v2, %v465_v55 }
 0x101   :  { %v250_v7 = vadd.f32 %v544_v4, %v175_v6  ;;  %v265_v8 = vmul.f32 %v253_v5, %v253_v5  ;;  %v256_v10 = vsel %vm255_vm1, %v253_v5, 0.0 }
 0x103   :  { %v254_v9 = vmax.f32 %v250_v7, 0.0  ;;  %v267_v14 = vsel %vm255_vm1, %v265_v8, 0.0 }
 0x105   :  { %v257_v11 = vsel %vm255_vm1, %v254_v9, 0.0  ;;  %v266_v12 = vmul.f32 %v254_v9, %v254_v9 }
 0x106   :  { %v258_v13 = vadd.f32 %v257_v11, %v256_v10 }
 0x107   :  { %v268_v15 = vsel %vm255_vm1, %v266_v12, 0.0 }
 0x108   :  { %v259_v16 = vrot.slane %v258_v13, 4  ;;  %v269_v17 = vadd.f32 %v268_v15, %v267_v14 }
 0x10a   :  { %v260_v18 = vadd.f32 %v259_v16, %v258_v13  ;;  %v270_v19 = vrot.slane %v269_v17, 4 }
 0x10c   :  { %v261_v20 = vrot.slane %v260_v18, 2  ;;  %v271_v21 = vadd.f32 %v270_v19, %v269_v17 }
 0x10e   :  { %v262_v22 = vadd.f32 %v261_v20, %v260_v18  ;;  %v272_v23 = vrot.slane %v271_v21, 2 }
 0x110   :  { %v263_v24 = vrot.slane %v262_v22, 1  ;;  %v273_v25 = vadd.f32 %v272_v23, %v271_v21 }
 0x112   :  { %v264_v26 = vadd.f32 %v263_v24, %v262_v22  ;;  %v274_v27 = vrot.slane %v273_v25, 1 }
 0x114   :  { %v275_v28 = vadd.f32 %v274_v27, %v273_v25  ;;  %v277_v29 = vmul.f32 0.0625, %v264_v26 }
 0x116   :  { %v278_v30 = vmul.f32 0.0625, %v275_v28  ;;  %v279_v31 = vmul.f32 %v277_v29, %v277_v29  ;;  %v282_v32 = vsub.f32 %v254_v9, %v277_v29  ;;  %v281_v33 = vsub.f32 %v253_v5, %v277_v29 }
 0x118   :  { %v280_v34 = vsub.f32 %v278_v30, %v279_v31 }
 0x11a   :  { %v283_v35 = vadd.f32 1e-05, %v280_v34 }
 0x11c   :  { %666 = vrsqrt.f32 %v283_v35 }
 0x126   :  { %v667_v36 = vpop.eup %666 }
 0x127   :  { %v285_v37 = vmul.f32 %v667_v36, %v281_v33  ;;  %v286_v38 = vmul.f32 %v667_v36, %v282_v32 }
 0x129   :  { %v648_v39 = vpack.c.bf16 %v286_v38, %v285_v37 }
 0x12b   :  { %649 = vmatpush3.bf16.msra.mxu0 %v648_v39 }
 0x12e   :  { %562 = vmatmul.mubr.msk.f32.vlgmr.msra.gmra.mrb[4].mxu0 %vm288_vm2, %v287_v40 }
 0x201   :  { %v358_v41 = vpop.f32.mrb[4].mxu0 }
 0x202   :  { %v563_v42 = vpop.f32.mrb[5].mxu0  ;;  %581 = vmatmul.mubr.msk.f32.vlgmr.msra.gmra.mrb[4].mxu1 %vm255_vm1, %v358_v41 }
 0x2d5   :  { %v446_v44 = vpop.f32.mrb[4].mxu1 }
 0x2d6   :  { %v447_v45 = vadd.f32 %v467_v43, %v446_v44  ;;  %v582_v46 = vpop.f32.mrb[5].mxu1 }
 0x2d8   :  { %450 = vst [vmem:[#allocation2] sm:$0x3] %v447_v45 }
 0x2d9   :  { %679 = shalt.err (!%p676_p4)
}
 0x2da   :  { %s680_s18 = scalar_lea.hbm %s1003_s6, 32 }
 0x2db   :  { %p681_p5 = scmp.ne.s32.totalorder %s1003_s6, %s680_s18  ;;  %p684_p6 = scmp.lt.u32.totalorder %s680_s18, %s1003_s6 }
 0x2dd   :  { %p686_p7 = pnand %p684_p6, %p681_p5 }
 0x2df   :  { %689 = shalt.err (!%p686_p7)
}
 0x2e0   :  { %460 = dma.vmem_to_hbm [thread:$0]  %s458_s15, 32, %s1003_s6, [#allocation3]  }
 0x2e1   :  { %690 = dma.done.wait [#allocation3], 32  }
 0x2e2   :  { %691 = vsyncadd [#allocation3], 4294967264 }
 0x2e3   :  { %464 = vsyncpa [#allocation3], 1 }

</bundles_post_ra>
